<compile_context>
chip_gen: v7x
topology: tpu7x:2x2x1
jax: 0.10.0
libtpu: 0.0.40
codegen_flags: <defaults>
</compile_context>

<pallas_src>
import jax
import jax.numpy as jnp
import numpy as np
from jax.experimental import pallas as pl
from jax.experimental.pallas import tpu as pltpu

HIDDEN = 24  # LSTM hidden size (fixed by the module definition)


def _lstm_l2o_kernel(pre0_ref, xbt_ref, hc0_ref, wm_ref, wr_ref, y_ref, hcn_ref):
    """Grid-less 2-layer LSTM + Linear(24,1) + x*out, everything VMEM-resident.

    pre0_ref : (T, B, 4H) hoisted layer-0 input term  x*W_ih_l0 + (b_ih+b_hh)_l0
    xbt_ref  : (B, T)     input x, (batch, time) layout for the final scaling
    hc0_ref  : (4, B, H)  [h_l0, h_l1, c_l0, c_l1] initial state
    wm_ref   : (3, H, 4H) gate-fused, transposed weights:
               [0] W_hh_l0^T, [1] W_ih_l1^T, [2] W_hh_l1^T  (gate order i,f,g,o)
    wr_ref   : (2, 1, 4H) [0] = b_ih_l1 + b_hh_l1 (fused),
               [1][:, 0:H] = linear weight row, [1][:, H] = linear bias
    y_ref    : (B, T)     output  x * linear(out), (batch, time) layout
    hcn_ref  : (4, B, H)  [h_l0, h_l1, c_l0, c_l1] final state
    """
    H = HIDDEN
    B, T = xbt_ref.shape

    # ---- hoisted weight / bias loads (outside the unrolled recurrence) ----
    whh0 = wm_ref[0]                      # (H, 4H)
    wih1 = wm_ref[1]                      # (H, 4H)
    whh1 = wm_ref[2]                      # (H, 4H)
    b1 = wr_ref[0]                        # (1, 4H)
    wr1 = wr_ref[1]                       # (1, 4H)
    wlin = wr1[:, 0:H]                    # (1, H)   linear weight row
    blin = wr1[:, H:H + 1]                # (1, 1)   linear bias

    # g-gate lane mask (lanes 2H:3H get tanh, the rest sigmoid); hoisted once.
    lane = jax.lax.broadcasted_iota(jnp.int32, (B, 4 * H), 1)
    is_g = jnp.logical_and(lane >= 2 * H, lane < 3 * H)

    # Carried state, kept in vregs across the unrolled recurrence.
    h_l0 = hc0_ref[0]
    h_l1 = hc0_ref[1]
    c_l0 = hc0_ref[2]
    c_l1 = hc0_ref[3]

    def cell(pre, c_prev):
        # Full-width EUP ops on the fused (B, 4H) pre-activation, then a lane
        # select for the g gate; gate extraction is static lane slices (XLU).
        sig = jax.nn.sigmoid(pre)
        tnh = jnp.tanh(pre)
        act = jnp.where(is_g, tnh, sig)
        i_g = act[:, 0:H]
        f_g = act[:, H:2 * H]
        g_g = act[:, 2 * H:3 * H]
        o_g = act[:, 3 * H:4 * H]
        c_new = f_g * c_prev + i_g * g_g
        h_new = o_g * jnp.tanh(c_new)
        return h_new, c_new

    for t in range(T):                    # T is small & static -> unroll
        # ---- layer 0: input/bias term already hoisted, one fused matmul ----
        pre0 = pre0_ref[t] + jnp.dot(h_l0, whh0,
                                     preferred_element_type=jnp.float32)
        h_l0, c_l0 = cell(pre0, c_l0)

        # ---- layer 1: two fused matmuls (h_l1 term overlaps layer-0 work) ----
        pre1 = (jnp.dot(h_l0, wih1, preferred_element_type=jnp.float32)
                + jnp.dot(h_l1, whh1, preferred_element_type=jnp.float32)
                + b1)
        h_l1, c_l1 = cell(pre1, c_l1)

        # ---- Linear(24,1) as a lane reduce while h_l1 is still in vregs ----
        s_t = jnp.sum(h_l1 * wlin, axis=-1, keepdims=True) + blin   # (B, 1)
        y_ref[:, t:t + 1] = xbt_ref[:, t:t + 1] * s_t

    hcn_ref[0] = h_l0
    hcn_ref[1] = h_l1
    hcn_ref[2] = c_l0
    hcn_ref[3] = c_l1


def pack_params(params):
    """One-time repack of PyTorch-layout LSTM/Linear params into gate-fused,
    transposed matrices (done once, outside the hot path)."""
    H = HIDDEN
    f32 = jnp.float32

    # Fused (H, 4H) = (24, 96) matrices; gate order along the 4H axis stays
    # PyTorch's (i, f, g, o), so the g gate occupies lanes 2H:3H.
    whh0_f = params["w_hh_l0"].T.astype(f32)          # (H, 4H)
    wih1_f = params["w_ih_l1"].T.astype(f32)          # (H, 4H)
    whh1_f = params["w_hh_l1"].T.astype(f32)          # (H, 4H)
    wm = jnp.stack([whh0_f, wih1_f, whh1_f], axis=0)  # (3, H, 4H)

    b1 = (params["b_ih_l1"] + params["b_hh_l1"]).astype(f32).reshape(1, 4 * H)
    row1 = jnp.zeros((1, 4 * H), f32)
    row1 = row1.at[0, 0:H].set(params["w_lin"].reshape(H).astype(f32))
    row1 = row1.at[0, H].set(params["b_lin"].reshape(())[()].astype(f32))
    wr = jnp.stack([b1, row1], axis=0)                # (2, 1, 4H)

    # Layer-0 input weights / fused bias, used by the wrapper-side hoist.
    wih0_row = params["w_ih_l0"].astype(f32).reshape(4 * H)          # input_size == 1
    b0_row = (params["b_ih_l0"] + params["b_hh_l0"]).astype(f32).reshape(4 * H)

    return {"wm": wm, "wr": wr, "wih0_row": wih0_row, "b0_row": b0_row}


def lstm_l2o_forward(x, h_in, packed):
    """x: (T, B, 1); h_in = (h0, c0), each (2, B, 24); packed = pack_params(...)."""
    T, B, _ = x.shape
    x32 = x.astype(jnp.float32)

    # Hoist layer 0's input + bias contribution out of the serial recurrence:
    # one batched broadcast-multiply-add over all T steps.
    pre0_all = x32 * packed["wih0_row"] + packed["b0_row"]          # (T, B, 4H)

    x_bt = jnp.transpose(x32.reshape(T, B))                         # (B, T)
    hc0 = jnp.concatenate([h_in[0], h_in[1]], axis=0).astype(jnp.float32)  # (4,B,H)

    vm = pl.BlockSpec(memory_space=pltpu.MemorySpace.VMEM)

    y_bt, hcn = pl.pallas_call(
        _lstm_l2o_kernel,
        out_shape=(
            jax.ShapeDtypeStruct((B, T), jnp.float32),
            jax.ShapeDtypeStruct((4, B, HIDDEN), jnp.float32),
        ),
        in_specs=[vm] * 5,
        out_specs=(vm, vm),
    )(pre0_all, x_bt, hc0, packed["wm"], packed["wr"])

    y = jnp.transpose(y_bt).reshape(T, B, 1)
    return y, (hcn[0:2], hcn[2:4])


def _reference_forward(x, h_in, params):
    """Pure-JAX reference with identical math (PyTorch nn.LSTM gate order i,f,g,o)."""
    H = HIDDEN
    T = x.shape[0]
    h = [h_in[0][0], h_in[0][1]]
    c = [h_in[1][0], h_in[1][1]]
    outs = []
    for t in range(T):
        inp = x[t]                                # (B, 1) then (B, H) for layer 1
        for l in range(2):
            w_ih = params[f"w_ih_l{l}"]
            w_hh = params[f"w_hh_l{l}"]
            b = params[f"b_ih_l{l}"] + params[f"b_hh_l{l}"]
            gates = inp @ w_ih.T + h[l] @ w_hh.T + b
            i_g = jax.nn.sigmoid(gates[:, 0 * H:1 * H])
            f_g = jax.nn.sigmoid(gates[:, 1 * H:2 * H])
            g_g = jnp.tanh(gates[:, 2 * H:3 * H])
            o_g = jax.nn.sigmoid(gates[:, 3 * H:4 * H])
            c[l] = f_g * c[l] + i_g * g_g
            h[l] = o_g * jnp.tanh(c[l])
            inp = h[l]
        outs.append(h[1])
    out = jnp.stack(outs)                         # (T, B, H)
    s = out @ params["w_lin"].T + params["b_lin"]  # (T, B, 1)
    return x * s, (jnp.stack(h), jnp.stack(c))


def _init_params(key):
    ks = jax.random.split(key, 10)
    s = 1.0 / float(np.sqrt(HIDDEN))

    def u(k, shape):
        return jax.random.uniform(k, shape, jnp.float32, -s, s)

    return {
        "w_ih_l0": u(ks[0], (4 * HIDDEN, 1)),
        "w_hh_l0": u(ks[1], (4 * HIDDEN, HIDDEN)),
        "b_ih_l0": u(ks[2], (4 * HIDDEN,)),
        "b_hh_l0": u(ks[3], (4 * HIDDEN,)),
        "w_ih_l1": u(ks[4], (4 * HIDDEN, HIDDEN)),
        "w_hh_l1": u(ks[5], (4 * HIDDEN, HIDDEN)),
        "b_ih_l1": u(ks[6], (4 * HIDDEN,)),
        "b_hh_l1": u(ks[7], (4 * HIDDEN,)),
        "w_lin": u(ks[8], (1, HIDDEN)),
        "b_lin": u(ks[9], (1,)),
    }


if __name__ == "__main__":
    key = jax.random.PRNGKey(0)
    k_p, k_x, k_h, k_c = jax.random.split(key, 4)

    T, B = 8, 16                                  # seq_len, batch
    params = _init_params(k_p)

    x = jax.random.normal(k_x, (T, B, 1), jnp.float32)
    h0 = 0.1 * jax.random.normal(k_h, (2, B, HIDDEN), jnp.float32)
    c0 = 0.1 * jax.random.normal(k_c, (2, B, HIDDEN), jnp.float32)

    packed = pack_params(params)                  # one-time weight repack
    fwd = jax.jit(lstm_l2o_forward)

    y, (hn, cn) = fwd(x, (h0, c0), packed)
    jax.block_until_ready((y, hn, cn))

    y_ref, (hn_ref, cn_ref) = _reference_forward(x, (h0, c0), params)
    np.testing.assert_allclose(np.asarray(y), np.asarray(y_ref), rtol=1e-4, atol=1e-5)
    np.testing.assert_allclose(np.asarray(hn), np.asarray(hn_ref), rtol=1e-4, atol=1e-5)
    np.testing.assert_allclose(np.asarray(cn), np.asarray(cn_ref), rtol=1e-4, atol=1e-5)

    print("KERNEL_OK")
</pallas_src>

<mosaic_0001>
module attributes {stable_mosaic.version = 11 : i64} {
  func.func @_lstm_l2o_kernel(%arg0: memref<8x16x96xf32, #tpu.memory_space<vmem>>, %arg1: memref<16x8xf32, #tpu.memory_space<vmem>>, %arg2: memref<4x16x24xf32, #tpu.memory_space<vmem>>, %arg3: memref<3x24x96xf32, #tpu.memory_space<vmem>>, %arg4: memref<2x1x96xf32, #tpu.memory_space<vmem>>, %arg5: memref<16x8xf32, #tpu.memory_space<vmem>>, %arg6: memref<4x16x24xf32, #tpu.memory_space<vmem>>) attributes {dimension_semantics = [], scalar_prefetch = 0 : i64, scratch_operands = 0 : i64, tpu.core_type = #tpu.core_type<tc>} {
    %c0 = arith.constant 0 : index
    %c0_0 = arith.constant 0 : index
    %c0_1 = arith.constant 0 : index
    %0 = vector.load %arg3[%c0, %c0_0, %c0_1] : memref<3x24x96xf32, #tpu.memory_space<vmem>>, vector<1x24x96xf32>
    %1 = vector.shape_cast %0 : vector<1x24x96xf32> to vector<24x96xf32>
    %c1 = arith.constant 1 : index
    %c0_2 = arith.constant 0 : index
    %c0_3 = arith.constant 0 : index
    %2 = vector.load %arg3[%c1, %c0_2, %c0_3] : memref<3x24x96xf32, #tpu.memory_space<vmem>>, vector<1x24x96xf32>
    %3 = vector.shape_cast %2 : vector<1x24x96xf32> to vector<24x96xf32>
    %c2 = arith.constant 2 : index
    %c0_4 = arith.constant 0 : index
    %c0_5 = arith.constant 0 : index
    %4 = vector.load %arg3[%c2, %c0_4, %c0_5] : memref<3x24x96xf32, #tpu.memory_space<vmem>>, vector<1x24x96xf32>
    %5 = vector.shape_cast %4 : vector<1x24x96xf32> to vector<24x96xf32>
    %c0_6 = arith.constant 0 : index
    %c0_7 = arith.constant 0 : index
    %c0_8 = arith.constant 0 : index
    %6 = vector.load %arg4[%c0_6, %c0_7, %c0_8] : memref<2x1x96xf32, #tpu.memory_space<vmem>>, vector<1x1x96xf32>
    %7 = vector.shape_cast %6 : vector<1x1x96xf32> to vector<1x96xf32>
    %c1_9 = arith.constant 1 : index
    %c0_10 = arith.constant 0 : index
    %c0_11 = arith.constant 0 : index
    %8 = vector.load %arg4[%c1_9, %c0_10, %c0_11] : memref<2x1x96xf32, #tpu.memory_space<vmem>>, vector<1x1x96xf32>
    %9 = vector.shape_cast %8 : vector<1x1x96xf32> to vector<1x96xf32>
    %10 = vector.extract_strided_slice %9 {offsets = [0, 0], sizes = [1, 24], strides = [1, 1]} : vector<1x96xf32> to vector<1x24xf32>
    %11 = vector.extract_strided_slice %9 {offsets = [0, 24], sizes = [1, 1], strides = [1, 1]} : vector<1x96xf32> to vector<1x1xf32>
    %12 = tpu.iota {dimensions = array<i32: 1>} : vector<16x96xi32>
    %c48_i32 = arith.constant 48 : i32
    %13 = vector.broadcast %c48_i32 : i32 to vector<16x96xi32>
    %14 = arith.cmpi sge, %12, %13 : vector<16x96xi32>
    %c72_i32 = arith.constant 72 : i32
    %15 = vector.broadcast %c72_i32 : i32 to vector<16x96xi32>
    %16 = arith.cmpi slt, %12, %15 : vector<16x96xi32>
    %17 = arith.andi %14, %16 : vector<16x96xi1>
    %c0_12 = arith.constant 0 : index
    %c0_13 = arith.constant 0 : index
    %c0_14 = arith.constant 0 : index
    %18 = vector.load %arg2[%c0_12, %c0_13, %c0_14] : memref<4x16x24xf32, #tpu.memory_space<vmem>>, vector<1x16x24xf32>
    %19 = vector.shape_cast %18 : vector<1x16x24xf32> to vector<16x24xf32>
    %c1_15 = arith.constant 1 : index
    %c0_16 = arith.constant 0 : index
    %c0_17 = arith.constant 0 : index
    %20 = vector.load %arg2[%c1_15, %c0_16, %c0_17] : memref<4x16x24xf32, #tpu.memory_space<vmem>>, vector<1x16x24xf32>
    %21 = vector.shape_cast %20 : vector<1x16x24xf32> to vector<16x24xf32>
    %c2_18 = arith.constant 2 : index
    %c0_19 = arith.constant 0 : index
    %c0_20 = arith.constant 0 : index
    %22 = vector.load %arg2[%c2_18, %c0_19, %c0_20] : memref<4x16x24xf32, #tpu.memory_space<vmem>>, vector<1x16x24xf32>
    %23 = vector.shape_cast %22 : vector<1x16x24xf32> to vector<16x24xf32>
    %c3 = arith.constant 3 : index
    %c0_21 = arith.constant 0 : index
    %c0_22 = arith.constant 0 : index
    %24 = vector.load %arg2[%c3, %c0_21, %c0_22] : memref<4x16x24xf32, #tpu.memory_space<vmem>>, vector<1x16x24xf32>
    %25 = vector.shape_cast %24 : vector<1x16x24xf32> to vector<16x24xf32>
    %c0_23 = arith.constant 0 : index
    %c0_24 = arith.constant 0 : index
    %c0_25 = arith.constant 0 : index
    %26 = vector.load %arg0[%c0_23, %c0_24, %c0_25] : memref<8x16x96xf32, #tpu.memory_space<vmem>>, vector<1x16x96xf32>
    %27 = vector.shape_cast %26 : vector<1x16x96xf32> to vector<16x96xf32>
    %cst = arith.constant dense<0.000000e+00> : vector<16x96xf32>
    %28 = tpu.matmul %19, %1, %cst {dimension_numbers = #tpu.dot_dimension_numbers<[1], [0], [0], [1], [0, 0, 1, 1], [], []>} : vector<16x24xf32>, vector<24x96xf32>, vector<16x96xf32> -> vector<16x96xf32>
    %29 = arith.addf %27, %28 : vector<16x96xf32>
    %30 = arith.negf %29 : vector<16x96xf32>
    %31 = math.exp %30 : vector<16x96xf32>
    %cst_26 = arith.constant 1.000000e+00 : f32
    %32 = vector.broadcast %cst_26 : f32 to vector<16x96xf32>
    %33 = arith.addf %32, %31 : vector<16x96xf32>
    %34 = arith.divf %32, %33 : vector<16x96xf32>
    %35 = math.tanh %29 : vector<16x96xf32>
    %36 = arith.select %17, %35, %34 : vector<16x96xi1>, vector<16x96xf32>
    %37 = vector.extract_strided_slice %36 {offsets = [0, 0], sizes = [16, 24], strides = [1, 1]} : vector<16x96xf32> to vector<16x24xf32>
    %38 = vector.extract_strided_slice %36 {offsets = [0, 24], sizes = [16, 24], strides = [1, 1]} : vector<16x96xf32> to vector<16x24xf32>
    %39 = vector.extract_strided_slice %36 {offsets = [0, 48], sizes = [16, 24], strides = [1, 1]} : vector<16x96xf32> to vector<16x24xf32>
    %40 = vector.extract_strided_slice %36 {offsets = [0, 72], sizes = [16, 24], strides = [1, 1]} : vector<16x96xf32> to vector<16x24xf32>
    %41 = arith.mulf %38, %23 : vector<16x24xf32>
    %42 = arith.mulf %37, %39 : vector<16x24xf32>
    %43 = arith.addf %41, %42 : vector<16x24xf32>
    %44 = math.tanh %43 : vector<16x24xf32>
    %45 = arith.mulf %40, %44 : vector<16x24xf32>
    %cst_27 = arith.constant dense<0.000000e+00> : vector<16x96xf32>
    %46 = tpu.matmul %45, %3, %cst_27 {dimension_numbers = #tpu.dot_dimension_numbers<[1], [0], [0], [1], [0, 0, 1, 1], [], []>} : vector<16x24xf32>, vector<24x96xf32>, vector<16x96xf32> -> vector<16x96xf32>
    %cst_28 = arith.constant dense<0.000000e+00> : vector<16x96xf32>
    %47 = tpu.matmul %21, %5, %cst_28 {dimension_numbers = #tpu.dot_dimension_numbers<[1], [0], [0], [1], [0, 0, 1, 1], [], []>} : vector<16x24xf32>, vector<24x96xf32>, vector<16x96xf32> -> vector<16x96xf32>
    %48 = arith.addf %46, %47 : vector<16x96xf32>
    %49 = vector.broadcast %7 : vector<1x96xf32> to vector<16x96xf32>
    %50 = arith.addf %48, %49 : vector<16x96xf32>
    %51 = arith.negf %50 : vector<16x96xf32>
    %52 = math.exp %51 : vector<16x96xf32>
    %cst_29 = arith.constant 1.000000e+00 : f32
    %53 = vector.broadcast %cst_29 : f32 to vector<16x96xf32>
    %54 = arith.addf %53, %52 : vector<16x96xf32>
    %55 = arith.divf %53, %54 : vector<16x96xf32>
    %56 = math.tanh %50 : vector<16x96xf32>
    %57 = arith.select %17, %56, %55 : vector<16x96xi1>, vector<16x96xf32>
    %58 = vector.extract_strided_slice %57 {offsets = [0, 0], sizes = [16, 24], strides = [1, 1]} : vector<16x96xf32> to vector<16x24xf32>
    %59 = vector.extract_strided_slice %57 {offsets = [0, 24], sizes = [16, 24], strides = [1, 1]} : vector<16x96xf32> to vector<16x24xf32>
    %60 = vector.extract_strided_slice %57 {offsets = [0, 48], sizes = [16, 24], strides = [1, 1]} : vector<16x96xf32> to vector<16x24xf32>
    %61 = vector.extract_strided_slice %57 {offsets = [0, 72], sizes = [16, 24], strides = [1, 1]} : vector<16x96xf32> to vector<16x24xf32>
    %62 = arith.mulf %59, %25 : vector<16x24xf32>
    %63 = arith.mulf %58, %60 : vector<16x24xf32>
    %64 = arith.addf %62, %63 : vector<16x24xf32>
    %65 = math.tanh %64 : vector<16x24xf32>
    %66 = arith.mulf %61, %65 : vector<16x24xf32>
    %67 = vector.broadcast %10 : vector<1x24xf32> to vector<16x24xf32>
    %68 = arith.mulf %66, %67 : vector<16x24xf32>
    %cst_30 = arith.constant dense<0.000000e+00> : vector<16xf32>
    %69 = vector.multi_reduction <add>, %68, %cst_30 [1] : vector<16x24xf32> to vector<16xf32>
    %70 = vector.shape_cast %69 : vector<16xf32> to vector<16x1xf32>
    %71 = vector.broadcast %11 : vector<1x1xf32> to vector<16x1xf32>
    %72 = arith.addf %70, %71 : vector<16x1xf32>
    %c0_31 = arith.constant 0 : index
    %c0_32 = arith.constant 0 : index
    %73 = vector.load %arg1[%c0_31, %c0_32] : memref<16x8xf32, #tpu.memory_space<vmem>>, vector<16x1xf32>
    %74 = arith.mulf %73, %72 : vector<16x1xf32>
    %c0_33 = arith.constant 0 : index
    %c0_34 = arith.constant 0 : index
    %75 = vector.load %arg5[%c0_33, %c0_34] : memref<16x8xf32, #tpu.memory_space<vmem>>, vector<16x1xf32>
    tpu.vector_store %arg5[%c0_33, %c0_34], %74 {strides = array<i32>} : memref<16x8xf32, #tpu.memory_space<vmem>>, vector<16x1xf32>,
    %c1_35 = arith.constant 1 : index
    %c0_36 = arith.constant 0 : index
    %c0_37 = arith.constant 0 : index
    %76 = vector.load %arg0[%c1_35, %c0_36, %c0_37] : memref<8x16x96xf32, #tpu.memory_space<vmem>>, vector<1x16x96xf32>
    %77 = vector.shape_cast %76 : vector<1x16x96xf32> to vector<16x96xf32>
    %cst_38 = arith.constant dense<0.000000e+00> : vector<16x96xf32>
    %78 = tpu.matmul %45, %1, %cst_38 {dimension_numbers = #tpu.dot_dimension_numbers<[1], [0], [0], [1], [0, 0, 1, 1], [], []>} : vector<16x24xf32>, vector<24x96xf32>, vector<16x96xf32> -> vector<16x96xf32>
    %79 = arith.addf %77, %78 : vector<16x96xf32>
    %80 = arith.negf %79 : vector<16x96xf32>
    %81 = math.exp %80 : vector<16x96xf32>
    %cst_39 = arith.constant 1.000000e+00 : f32
    %82 = vector.broadcast %cst_39 : f32 to vector<16x96xf32>
    %83 = arith.addf %82, %81 : vector<16x96xf32>
    %84 = arith.divf %82, %83 : vector<16x96xf32>
    %85 = math.tanh %79 : vector<16x96xf32>
    %86 = arith.select %17, %85, %84 : vector<16x96xi1>, vector<16x96xf32>
    %87 = vector.extract_strided_slice %86 {offsets = [0, 0], sizes = [16, 24], strides = [1, 1]} : vector<16x96xf32> to vector<16x24xf32>
    %88 = vector.extract_strided_slice %86 {offsets = [0, 24], sizes = [16, 24], strides = [1, 1]} : vector<16x96xf32> to vector<16x24xf32>
    %89 = vector.extract_strided_slice %86 {offsets = [0, 48], sizes = [16, 24], strides = [1, 1]} : vector<16x96xf32> to vector<16x24xf32>
    %90 = vector.extract_strided_slice %86 {offsets = [0, 72], sizes = [16, 24], strides = [1, 1]} : vector<16x96xf32> to vector<16x24xf32>
    %91 = arith.mulf %88, %43 : vector<16x24xf32>
    %92 = arith.mulf %87, %89 : vector<16x24xf32>
    %93 = arith.addf %91, %92 : vector<16x24xf32>
    %94 = math.tanh %93 : vector<16x24xf32>
    %95 = arith.mulf %90, %94 : vector<16x24xf32>
    %cst_40 = arith.constant dense<0.000000e+00> : vector<16x96xf32>
    %96 = tpu.matmul %95, %3, %cst_40 {dimension_numbers = #tpu.dot_dimension_numbers<[1], [0], [0], [1], [0, 0, 1, 1], [], []>} : vector<16x24xf32>, vector<24x96xf32>, vector<16x96xf32> -> vector<16x96xf32>
    %cst_41 = arith.constant dense<0.000000e+00> : vector<16x96xf32>
    %97 = tpu.matmul %66, %5, %cst_41 {dimension_numbers = #tpu.dot_dimension_numbers<[1], [0], [0], [1], [0, 0, 1, 1], [], []>} : vector<16x24xf32>, vector<24x96xf32>, vector<16x96xf32> -> vector<16x96xf32>
    %98 = arith.addf %96, %97 : vector<16x96xf32>
    %99 = vector.broadcast %7 : vector<1x96xf32> to vector<16x96xf32>
    %100 = arith.addf %98, %99 : vector<16x96xf32>
    %101 = arith.negf %100 : vector<16x96xf32>
    %102 = math.exp %101 : vector<16x96xf32>
    %cst_42 = arith.constant 1.000000e+00 : f32
    %103 = vector.broadcast %cst_42 : f32 to vector<16x96xf32>
    %104 = arith.addf %103, %102 : vector<16x96xf32>
    %105 = arith.divf %103, %104 : vector<16x96xf32>
    %106 = math.tanh %100 : vector<16x96xf32>
    %107 = arith.select %17, %106, %105 : vector<16x96xi1>, vector<16x96xf32>
    %108 = vector.extract_strided_slice %107 {offsets = [0, 0], sizes = [16, 24], strides = [1, 1]} : vector<16x96xf32> to vector<16x24xf32>
    %109 = vector.extract_strided_slice %107 {offsets = [0, 24], sizes = [16, 24], strides = [1, 1]} : vector<16x96xf32> to vector<16x24xf32>
    %110 = vector.extract_strided_slice %107 {offsets = [0, 48], sizes = [16, 24], strides = [1, 1]} : vector<16x96xf32> to vector<16x24xf32>
    %111 = vector.extract_strided_slice %107 {offsets = [0, 72], sizes = [16, 24], strides = [1, 1]} : vector<16x96xf32> to vector<16x24xf32>
    %112 = arith.mulf %109, %64 : vector<16x24xf32>
    %113 = arith.mulf %108, %110 : vector<16x24xf32>
    %114 = arith.addf %112, %113 : vector<16x24xf32>
    %115 = math.tanh %114 : vector<16x24xf32>
    %116 = arith.mulf %111, %115 : vector<16x24xf32>
    %117 = vector.broadcast %10 : vector<1x24xf32> to vector<16x24xf32>
    %118 = arith.mulf %116, %117 : vector<16x24xf32>
    %cst_43 = arith.constant dense<0.000000e+00> : vector<16xf32>
    %119 = vector.multi_reduction <add>, %118, %cst_43 [1] : vector<16x24xf32> to vector<16xf32>
    %120 = vector.shape_cast %119 : vector<16xf32> to vector<16x1xf32>
    %121 = vector.broadcast %11 : vector<1x1xf32> to vector<16x1xf32>
    %122 = arith.addf %120, %121 : vector<16x1xf32>
    %c0_44 = arith.constant 0 : index
    %c1_45 = arith.constant 1 : index
    %123 = vector.load %arg1[%c0_44, %c1_45] : memref<16x8xf32, #tpu.memory_space<vmem>>, vector<16x1xf32>
    %124 = arith.mulf %123, %122 : vector<16x1xf32>
    %c0_46 = arith.constant 0 : index
    %c1_47 = arith.constant 1 : index
    %125 = vector.load %arg5[%c0_46, %c1_47] : memref<16x8xf32, #tpu.memory_space<vmem>>, vector<16x1xf32>
    tpu.vector_store %arg5[%c0_46, %c1_47], %124 {strides = array<i32>} : memref<16x8xf32, #tpu.memory_space<vmem>>, vector<16x1xf32>,
    %c2_48 = arith.constant 2 : index
    %c0_49 = arith.constant 0 : index
    %c0_50 = arith.constant 0 : index
    %126 = vector.load %arg0[%c2_48, %c0_49, %c0_50] : memref<8x16x96xf32, #tpu.memory_space<vmem>>, vector<1x16x96xf32>
    %127 = vector.shape_cast %126 : vector<1x16x96xf32> to vector<16x96xf32>
    %cst_51 = arith.constant dense<0.000000e+00> : vector<16x96xf32>
    %128 = tpu.matmul %95, %1, %cst_51 {dimension_numbers = #tpu.dot_dimension_numbers<[1], [0], [0], [1], [0, 0, 1, 1], [], []>} : vector<16x24xf32>, vector<24x96xf32>, vector<16x96xf32> -> vector<16x96xf32>
    %129 = arith.addf %127, %128 : vector<16x96xf32>
    %130 = arith.negf %129 : vector<16x96xf32>
    %131 = math.exp %130 : vector<16x96xf32>
    %cst_52 = arith.constant 1.000000e+00 : f32
    %132 = vector.broadcast %cst_52 : f32 to vector<16x96xf32>
    %133 = arith.addf %132, %131 : vector<16x96xf32>
    %134 = arith.divf %132, %133 : vector<16x96xf32>
    %135 = math.tanh %129 : vector<16x96xf32>
    %136 = arith.select %17, %135, %134 : vector<16x96xi1>, vector<16x96xf32>
    %137 = vector.extract_strided_slice %136 {offsets = [0, 0], sizes = [16, 24], strides = [1, 1]} : vector<16x96xf32> to vector<16x24xf32>
    %138 = vector.extract_strided_slice %136 {offsets = [0, 24], sizes = [16, 24], strides = [1, 1]} : vector<16x96xf32> to vector<16x24xf32>
    %139 = vector.extract_strided_slice %136 {offsets = [0, 48], sizes = [16, 24], strides = [1, 1]} : vector<16x96xf32> to vector<16x24xf32>
    %140 = vector.extract_strided_slice %136 {offsets = [0, 72], sizes = [16, 24], strides = [1, 1]} : vector<16x96xf32> to vector<16x24xf32>
    %141 = arith.mulf %138, %93 : vector<16x24xf32>
    %142 = arith.mulf %137, %139 : vector<16x24xf32>
    %143 = arith.addf %141, %142 : vector<16x24xf32>
    %144 = math.tanh %143 : vector<16x24xf32>
    %145 = arith.mulf %140, %144 : vector<16x24xf32>
    %cst_53 = arith.constant dense<0.000000e+00> : vector<16x96xf32>
    %146 = tpu.matmul %145, %3, %cst_53 {dimension_numbers = #tpu.dot_dimension_numbers<[1], [0], [0], [1], [0, 0, 1, 1], [], []>} : vector<16x24xf32>, vector<24x96xf32>, vector<16x96xf32> -> vector<16x96xf32>
    %cst_54 = arith.constant dense<0.000000e+00> : vector<16x96xf32>
    %147 = tpu.matmul %116, %5, %cst_54 {dimension_numbers = #tpu.dot_dimension_numbers<[1], [0], [0], [1], [0, 0, 1, 1], [], []>} : vector<16x24xf32>, vector<24x96xf32>, vector<16x96xf32> -> vector<16x96xf32>
    %148 = arith.addf %146, %147 : vector<16x96xf32>
    %149 = vector.broadcast %7 : vector<1x96xf32> to vector<16x96xf32>
    %150 = arith.addf %148, %149 : vector<16x96xf32>
    %151 = arith.negf %150 : vector<16x96xf32>
    %152 = math.exp %151 : vector<16x96xf32>
    %cst_55 = arith.constant 1.000000e+00 : f32
    %153 = vector.broadcast %cst_55 : f32 to vector<16x96xf32>
    %154 = arith.addf %153, %152 : vector<16x96xf32>
    %155 = arith.divf %153, %154 : vector<16x96xf32>
    %156 = math.tanh %150 : vector<16x96xf32>
    %157 = arith.select %17, %156, %155 : vector<16x96xi1>, vector<16x96xf32>
    %158 = vector.extract_strided_slice %157 {offsets = [0, 0], sizes = [16, 24], strides = [1, 1]} : vector<16x96xf32> to vector<16x24xf32>
    %159 = vector.extract_strided_slice %157 {offsets = [0, 24], sizes = [16, 24], strides = [1, 1]} : vector<16x96xf32> to vector<16x24xf32>
    %160 = vector.extract_strided_slice %157 {offsets = [0, 48], sizes = [16, 24], strides = [1, 1]} : vector<16x96xf32> to vector<16x24xf32>
    %161 = vector.extract_strided_slice %157 {offsets = [0, 72], sizes = [16, 24], strides = [1, 1]} : vector<16x96xf32> to vector<16x24xf32>
    %162 = arith.mulf %159, %114 : vector<16x24xf32>
    %163 = arith.mulf %158, %160 : vector<16x24xf32>
    %164 = arith.addf %162, %163 : vector<16x24xf32>
    %165 = math.tanh %164 : vector<16x24xf32>
    %166 = arith.mulf %161, %165 : vector<16x24xf32>
    %167 = vector.broadcast %10 : vector<1x24xf32> to vector<16x24xf32>
    %168 = arith.mulf %166, %167 : vector<16x24xf32>
    %cst_56 = arith.constant dense<0.000000e+00> : vector<16xf32>
    %169 = vector.multi_reduction <add>, %168, %cst_56 [1] : vector<16x24xf32> to vector<16xf32>
    %170 = vector.shape_cast %169 : vector<16xf32> to vector<16x1xf32>
    %171 = vector.broadcast %11 : vector<1x1xf32> to vector<16x1xf32>
    %172 = arith.addf %170, %171 : vector<16x1xf32>
    %c0_57 = arith.constant 0 : index
    %c2_58 = arith.constant 2 : index
    %173 = vector.load %arg1[%c0_57, %c2_58] : memref<16x8xf32, #tpu.memory_space<vmem>>, vector<16x1xf32>
    %174 = arith.mulf %173, %172 : vector<16x1xf32>
    %c0_59 = arith.constant 0 : index
    %c2_60 = arith.constant 2 : index
    %175 = vector.load %arg5[%c0_59, %c2_60] : memref<16x8xf32, #tpu.memory_space<vmem>>, vector<16x1xf32>
    tpu.vector_store %arg5[%c0_59, %c2_60], %174 {strides = array<i32>} : memref<16x8xf32, #tpu.memory_space<vmem>>, vector<16x1xf32>,
    %c3_61 = arith.constant 3 : index
    %c0_62 = arith.constant 0 : index
    %c0_63 = arith.constant 0 : index
    %176 = vector.load %arg0[%c3_61, %c0_62, %c0_63] : memref<8x16x96xf32, #tpu.memory_space<vmem>>, vector<1x16x96xf32>
    %177 = vector.shape_cast %176 : vector<1x16x96xf32> to vector<16x96xf32>
    %cst_64 = arith.constant dense<0.000000e+00> : vector<16x96xf32>
    %178 = tpu.matmul %145, %1, %cst_64 {dimension_numbers = #tpu.dot_dimension_numbers<[1], [0], [0], [1], [0, 0, 1, 1], [], []>} : vector<16x24xf32>, vector<24x96xf32>, vector<16x96xf32> -> vector<16x96xf32>
    %179 = arith.addf %177, %178 : vector<16x96xf32>
    %180 = arith.negf %179 : vector<16x96xf32>
    %181 = math.exp %180 : vector<16x96xf32>
    %cst_65 = arith.constant 1.000000e+00 : f32
    %182 = vector.broadcast %cst_65 : f32 to vector<16x96xf32>
    %183 = arith.addf %182, %181 : vector<16x96xf32>
    %184 = arith.divf %182, %183 : vector<16x96xf32>
    %185 = math.tanh %179 : vector<16x96xf32>
    %186 = arith.select %17, %185, %184 : vector<16x96xi1>, vector<16x96xf32>
    %187 = vector.extract_strided_slice %186 {offsets = [0, 0], sizes = [16, 24], strides = [1, 1]} : vector<16x96xf32> to vector<16x24xf32>
    %188 = vector.extract_strided_slice %186 {offsets = [0, 24], sizes = [16, 24], strides = [1, 1]} : vector<16x96xf32> to vector<16x24xf32>
    %189 = vector.extract_strided_slice %186 {offsets = [0, 48], sizes = [16, 24], strides = [1, 1]} : vector<16x96xf32> to vector<16x24xf32>
    %190 = vector.extract_strided_slice %186 {offsets = [0, 72], sizes = [16, 24], strides = [1, 1]} : vector<16x96xf32> to vector<16x24xf32>
    %191 = arith.mulf %188, %143 : vector<16x24xf32>
    %192 = arith.mulf %187, %189 : vector<16x24xf32>
    %193 = arith.addf %191, %192 : vector<16x24xf32>
    %194 = math.tanh %193 : vector<16x24xf32>
    %195 = arith.mulf %190, %194 : vector<16x24xf32>
    %cst_66 = arith.constant dense<0.000000e+00> : vector<16x96xf32>
    %196 = tpu.matmul %195, %3, %cst_66 {dimension_numbers = #tpu.dot_dimension_numbers<[1], [0], [0], [1], [0, 0, 1, 1], [], []>} : vector<16x24xf32>, vector<24x96xf32>, vector<16x96xf32> -> vector<16x96xf32>
    %cst_67 = arith.constant dense<0.000000e+00> : vector<16x96xf32>
    %197 = tpu.matmul %166, %5, %cst_67 {dimension_numbers = #tpu.dot_dimension_numbers<[1], [0], [0], [1], [0, 0, 1, 1], [], []>} : vector<16x24xf32>, vector<24x96xf32>, vector<16x96xf32> -> vector<16x96xf32>
    %198 = arith.addf %196, %197 : vector<16x96xf32>
    %199 = vector.broadcast %7 : vector<1x96xf32> to vector<16x96xf32>
    %200 = arith.addf %198, %199 : vector<16x96xf32>
    %201 = arith.negf %200 : vector<16x96xf32>
    %202 = math.exp %201 : vector<16x96xf32>
    %cst_68 = arith.constant 1.000000e+00 : f32
    %203 = vector.broadcast %cst_68 : f32 to vector<16x96xf32>
    %204 = arith.addf %203, %202 : vector<16x96xf32>
    %205 = arith.divf %203, %204 : vector<16x96xf32>
    %206 = math.tanh %200 : vector<16x96xf32>
    %207 = arith.select %17, %206, %205 : vector<16x96xi1>, vector<16x96xf32>
    %208 = vector.extract_strided_slice %207 {offsets = [0, 0], sizes = [16, 24], strides = [1, 1]} : vector<16x96xf32> to vector<16x24xf32>
    %209 = vector.extract_strided_slice %207 {offsets = [0, 24], sizes = [16, 24], strides = [1, 1]} : vector<16x96xf32> to vector<16x24xf32>
    %210 = vector.extract_strided_slice %207 {offsets = [0, 48], sizes = [16, 24], strides = [1, 1]} : vector<16x96xf32> to vector<16x24xf32>
    %211 = vector.extract_strided_slice %207 {offsets = [0, 72], sizes = [16, 24], strides = [1, 1]} : vector<16x96xf32> to vector<16x24xf32>
    %212 = arith.mulf %209, %164 : vector<16x24xf32>
    %213 = arith.mulf %208, %210 : vector<16x24xf32>
    %214 = arith.addf %212, %213 : vector<16x24xf32>
    %215 = math.tanh %214 : vector<16x24xf32>
    %216 = arith.mulf %211, %215 : vector<16x24xf32>
    %217 = vector.broadcast %10 : vector<1x24xf32> to vector<16x24xf32>
    %218 = arith.mulf %216, %217 : vector<16x24xf32>
    %cst_69 = arith.constant dense<0.000000e+00> : vector<16xf32>
    %219 = vector.multi_reduction <add>, %218, %cst_69 [1] : vector<16x24xf32> to vector<16xf32>
    %220 = vector.shape_cast %219 : vector<16xf32> to vector<16x1xf32>
    %221 = vector.broadcast %11 : vector<1x1xf32> to vector<16x1xf32>
    %222 = arith.addf %220, %221 : vector<16x1xf32>
    %c0_70 = arith.constant 0 : index
    %c3_71 = arith.constant 3 : index
    %223 = vector.load %arg1[%c0_70, %c3_71] : memref<16x8xf32, #tpu.memory_space<vmem>>, vector<16x1xf32>
    %224 = arith.mulf %223, %222 : vector<16x1xf32>
    %c0_72 = arith.constant 0 : index
    %c3_73 = arith.constant 3 : index
    %225 = vector.load %arg5[%c0_72, %c3_73] : memref<16x8xf32, #tpu.memory_space<vmem>>, vector<16x1xf32>
    tpu.vector_store %arg5[%c0_72, %c3_73], %224 {strides = array<i32>} : memref<16x8xf32, #tpu.memory_space<vmem>>, vector<16x1xf32>,
    %c4 = arith.constant 4 : index
    %c0_74 = arith.constant 0 : index
    %c0_75 = arith.constant 0 : index
    %226 = vector.load %arg0[%c4, %c0_74, %c0_75] : memref<8x16x96xf32, #tpu.memory_space<vmem>>, vector<1x16x96xf32>
    %227 = vector.shape_cast %226 : vector<1x16x96xf32> to vector<16x96xf32>
    %cst_76 = arith.constant dense<0.000000e+00> : vector<16x96xf32>
    %228 = tpu.matmul %195, %1, %cst_76 {dimension_numbers = #tpu.dot_dimension_numbers<[1], [0], [0], [1], [0, 0, 1, 1], [], []>} : vector<16x24xf32>, vector<24x96xf32>, vector<16x96xf32> -> vector<16x96xf32>
    %229 = arith.addf %227, %228 : vector<16x96xf32>
    %230 = arith.negf %229 : vector<16x96xf32>
    %231 = math.exp %230 : vector<16x96xf32>
    %cst_77 = arith.constant 1.000000e+00 : f32
    %232 = vector.broadcast %cst_77 : f32 to vector<16x96xf32>
    %233 = arith.addf %232, %231 : vector<16x96xf32>
    %234 = arith.divf %232, %233 : vector<16x96xf32>
    %235 = math.tanh %229 : vector<16x96xf32>
    %236 = arith.select %17, %235, %234 : vector<16x96xi1>, vector<16x96xf32>
    %237 = vector.extract_strided_slice %236 {offsets = [0, 0], sizes = [16, 24], strides = [1, 1]} : vector<16x96xf32> to vector<16x24xf32>
    %238 = vector.extract_strided_slice %236 {offsets = [0, 24], sizes = [16, 24], strides = [1, 1]} : vector<16x96xf32> to vector<16x24xf32>
    %239 = vector.extract_strided_slice %236 {offsets = [0, 48], sizes = [16, 24], strides = [1, 1]} : vector<16x96xf32> to vector<16x24xf32>
    %240 = vector.extract_strided_slice %236 {offsets = [0, 72], sizes = [16, 24], strides = [1, 1]} : vector<16x96xf32> to vector<16x24xf32>
    %241 = arith.mulf %238, %193 : vector<16x24xf32>
    %242 = arith.mulf %237, %239 : vector<16x24xf32>
    %243 = arith.addf %241, %242 : vector<16x24xf32>
    %244 = math.tanh %243 : vector<16x24xf32>
    %245 = arith.mulf %240, %244 : vector<16x24xf32>
    %cst_78 = arith.constant dense<0.000000e+00> : vector<16x96xf32>
    %246 = tpu.matmul %245, %3, %cst_78 {dimension_numbers = #tpu.dot_dimension_numbers<[1], [0], [0], [1], [0, 0, 1, 1], [], []>} : vector<16x24xf32>, vector<24x96xf32>, vector<16x96xf32> -> vector<16x96xf32>
    %cst_79 = arith.constant dense<0.000000e+00> : vector<16x96xf32>
    %247 = tpu.matmul %216, %5, %cst_79 {dimension_numbers = #tpu.dot_dimension_numbers<[1], [0], [0], [1], [0, 0, 1, 1], [], []>} : vector<16x24xf32>, vector<24x96xf32>, vector<16x96xf32> -> vector<16x96xf32>
    %248 = arith.addf %246, %247 : vector<16x96xf32>
    %249 = vector.broadcast %7 : vector<1x96xf32> to vector<16x96xf32>
    %250 = arith.addf %248, %249 : vector<16x96xf32>
    %251 = arith.negf %250 : vector<16x96xf32>
    %252 = math.exp %251 : vector<16x96xf32>
    %cst_80 = arith.constant 1.000000e+00 : f32
    %253 = vector.broadcast %cst_80 : f32 to vector<16x96xf32>
    %254 = arith.addf %253, %252 : vector<16x96xf32>
    %255 = arith.divf %253, %254 : vector<16x96xf32>
    %256 = math.tanh %250 : vector<16x96xf32>
    %257 = arith.select %17, %256, %255 : vector<16x96xi1>, vector<16x96xf32>
    %258 = vector.extract_strided_slice %257 {offsets = [0, 0], sizes = [16, 24], strides = [1, 1]} : vector<16x96xf32> to vector<16x24xf32>
    %259 = vector.extract_strided_slice %257 {offsets = [0, 24], sizes = [16, 24], strides = [1, 1]} : vector<16x96xf32> to vector<16x24xf32>
    %260 = vector.extract_strided_slice %257 {offsets = [0, 48], sizes = [16, 24], strides = [1, 1]} : vector<16x96xf32> to vector<16x24xf32>
    %261 = vector.extract_strided_slice %257 {offsets = [0, 72], sizes = [16, 24], strides = [1, 1]} : vector<16x96xf32> to vector<16x24xf32>
    %262 = arith.mulf %259, %214 : vector<16x24xf32>
    %263 = arith.mulf %258, %260 : vector<16x24xf32>
    %264 = arith.addf %262, %263 : vector<16x24xf32>
    %265 = math.tanh %264 : vector<16x24xf32>
    %266 = arith.mulf %261, %265 : vector<16x24xf32>
    %267 = vector.broadcast %10 : vector<1x24xf32> to vector<16x24xf32>
    %268 = arith.mulf %266, %267 : vector<16x24xf32>
    %cst_81 = arith.constant dense<0.000000e+00> : vector<16xf32>
    %269 = vector.multi_reduction <add>, %268, %cst_81 [1] : vector<16x24xf32> to vector<16xf32>
    %270 = vector.shape_cast %269 : vector<16xf32> to vector<16x1xf32>
    %271 = vector.broadcast %11 : vector<1x1xf32> to vector<16x1xf32>
    %272 = arith.addf %270, %271 : vector<16x1xf32>
    %c0_82 = arith.constant 0 : index
    %c4_83 = arith.constant 4 : index
    %273 = vector.load %arg1[%c0_82, %c4_83] : memref<16x8xf32, #tpu.memory_space<vmem>>, vector<16x1xf32>
    %274 = arith.mulf %273, %272 : vector<16x1xf32>
    %c0_84 = arith.constant 0 : index
    %c4_85 = arith.constant 4 : index
    %275 = vector.load %arg5[%c0_84, %c4_85] : memref<16x8xf32, #tpu.memory_space<vmem>>, vector<16x1xf32>
    tpu.vector_store %arg5[%c0_84, %c4_85], %274 {strides = array<i32>} : memref<16x8xf32, #tpu.memory_space<vmem>>, vector<16x1xf32>,
    %c5 = arith.constant 5 : index
    %c0_86 = arith.constant 0 : index
    %c0_87 = arith.constant 0 : index
    %276 = vector.load %arg0[%c5, %c0_86, %c0_87] : memref<8x16x96xf32, #tpu.memory_space<vmem>>, vector<1x16x96xf32>
    %277 = vector.shape_cast %276 : vector<1x16x96xf32> to vector<16x96xf32>
    %cst_88 = arith.constant dense<0.000000e+00> : vector<16x96xf32>
    %278 = tpu.matmul %245, %1, %cst_88 {dimension_numbers = #tpu.dot_dimension_numbers<[1], [0], [0], [1], [0, 0, 1, 1], [], []>} : vector<16x24xf32>, vector<24x96xf32>, vector<16x96xf32> -> vector<16x96xf32>
    %279 = arith.addf %277, %278 : vector<16x96xf32>
    %280 = arith.negf %279 : vector<16x96xf32>
    %281 = math.exp %280 : vector<16x96xf32>
    %cst_89 = arith.constant 1.000000e+00 : f32
    %282 = vector.broadcast %cst_89 : f32 to vector<16x96xf32>
    %283 = arith.addf %282, %281 : vector<16x96xf32>
    %284 = arith.divf %282, %283 : vector<16x96xf32>
    %285 = math.tanh %279 : vector<16x96xf32>
    %286 = arith.select %17, %285, %284 : vector<16x96xi1>, vector<16x96xf32>
    %287 = vector.extract_strided_slice %286 {offsets = [0, 0], sizes = [16, 24], strides = [1, 1]} : vector<16x96xf32> to vector<16x24xf32>
    %288 = vector.extract_strided_slice %286 {offsets = [0, 24], sizes = [16, 24], strides = [1, 1]} : vector<16x96xf32> to vector<16x24xf32>
    %289 = vector.extract_strided_slice %286 {offsets = [0, 48], sizes = [16, 24], strides = [1, 1]} : vector<16x96xf32> to vector<16x24xf32>
    %290 = vector.extract_strided_slice %286 {offsets = [0, 72], sizes = [16, 24], strides = [1, 1]} : vector<16x96xf32> to vector<16x24xf32>
    %291 = arith.mulf %288, %243 : vector<16x24xf32>
    %292 = arith.mulf %287, %289 : vector<16x24xf32>
    %293 = arith.addf %291, %292 : vector<16x24xf32>
    %294 = math.tanh %293 : vector<16x24xf32>
    %295 = arith.mulf %290, %294 : vector<16x24xf32>
    %cst_90 = arith.constant dense<0.000000e+00> : vector<16x96xf32>
    %296 = tpu.matmul %295, %3, %cst_90 {dimension_numbers = #tpu.dot_dimension_numbers<[1], [0], [0], [1], [0, 0, 1, 1], [], []>} : vector<16x24xf32>, vector<24x96xf32>, vector<16x96xf32> -> vector<16x96xf32>
    %cst_91 = arith.constant dense<0.000000e+00> : vector<16x96xf32>
    %297 = tpu.matmul %266, %5, %cst_91 {dimension_numbers = #tpu.dot_dimension_numbers<[1], [0], [0], [1], [0, 0, 1, 1], [], []>} : vector<16x24xf32>, vector<24x96xf32>, vector<16x96xf32> -> vector<16x96xf32>
    %298 = arith.addf %296, %297 : vector<16x96xf32>
    %299 = vector.broadcast %7 : vector<1x96xf32> to vector<16x96xf32>
    %300 = arith.addf %298, %299 : vector<16x96xf32>
    %301 = arith.negf %300 : vector<16x96xf32>
    %302 = math.exp %301 : vector<16x96xf32>
    %cst_92 = arith.constant 1.000000e+00 : f32
    %303 = vector.broadcast %cst_92 : f32 to vector<16x96xf32>
    %304 = arith.addf %303, %302 : vector<16x96xf32>
    %305 = arith.divf %303, %304 : vector<16x96xf32>
    %306 = math.tanh %300 : vector<16x96xf32>
    %307 = arith.select %17, %306, %305 : vector<16x96xi1>, vector<16x96xf32>
    %308 = vector.extract_strided_slice %307 {offsets = [0, 0], sizes = [16, 24], strides = [1, 1]} : vector<16x96xf32> to vector<16x24xf32>
    %309 = vector.extract_strided_slice %307 {offsets = [0, 24], sizes = [16, 24], strides = [1, 1]} : vector<16x96xf32> to vector<16x24xf32>
    %310 = vector.extract_strided_slice %307 {offsets = [0, 48], sizes = [16, 24], strides = [1, 1]} : vector<16x96xf32> to vector<16x24xf32>
    %311 = vector.extract_strided_slice %307 {offsets = [0, 72], sizes = [16, 24], strides = [1, 1]} : vector<16x96xf32> to vector<16x24xf32>
    %312 = arith.mulf %309, %264 : vector<16x24xf32>
    %313 = arith.mulf %308, %310 : vector<16x24xf32>
    %314 = arith.addf %312, %313 : vector<16x24xf32>
    %315 = math.tanh %314 : vector<16x24xf32>
    %316 = arith.mulf %311, %315 : vector<16x24xf32>
    %317 = vector.broadcast %10 : vector<1x24xf32> to vector<16x24xf32>
    %318 = arith.mulf %316, %317 : vector<16x24xf32>
    %cst_93 = arith.constant dense<0.000000e+00> : vector<16xf32>
    %319 = vector.multi_reduction <add>, %318, %cst_93 [1] : vector<16x24xf32> to vector<16xf32>
    %320 = vector.shape_cast %319 : vector<16xf32> to vector<16x1xf32>
    %321 = vector.broadcast %11 : vector<1x1xf32> to vector<16x1xf32>
    %322 = arith.addf %320, %321 : vector<16x1xf32>
    %c0_94 = arith.constant 0 : index
    %c5_95 = arith.constant 5 : index
    %323 = vector.load %arg1[%c0_94, %c5_95] : memref<16x8xf32, #tpu.memory_space<vmem>>, vector<16x1xf32>
    %324 = arith.mulf %323, %322 : vector<16x1xf32>
    %c0_96 = arith.constant 0 : index
    %c5_97 = arith.constant 5 : index
    %325 = vector.load %arg5[%c0_96, %c5_97] : memref<16x8xf32, #tpu.memory_space<vmem>>, vector<16x1xf32>
    tpu.vector_store %arg5[%c0_96, %c5_97], %324 {strides = array<i32>} : memref<16x8xf32, #tpu.memory_space<vmem>>, vector<16x1xf32>,
    %c6 = arith.constant 6 : index
    %c0_98 = arith.constant 0 : index
    %c0_99 = arith.constant 0 : index
    %326 = vector.load %arg0[%c6, %c0_98, %c0_99] : memref<8x16x96xf32, #tpu.memory_space<vmem>>, vector<1x16x96xf32>
    %327 = vector.shape_cast %326 : vector<1x16x96xf32> to vector<16x96xf32>
    %cst_100 = arith.constant dense<0.000000e+00> : vector<16x96xf32>
    %328 = tpu.matmul %295, %1, %cst_100 {dimension_numbers = #tpu.dot_dimension_numbers<[1], [0], [0], [1], [0, 0, 1, 1], [], []>} : vector<16x24xf32>, vector<24x96xf32>, vector<16x96xf32> -> vector<16x96xf32>
    %329 = arith.addf %327, %328 : vector<16x96xf32>
    %330 = arith.negf %329 : vector<16x96xf32>
    %331 = math.exp %330 : vector<16x96xf32>
    %cst_101 = arith.constant 1.000000e+00 : f32
    %332 = vector.broadcast %cst_101 : f32 to vector<16x96xf32>
    %333 = arith.addf %332, %331 : vector<16x96xf32>
    %334 = arith.divf %332, %333 : vector<16x96xf32>
    %335 = math.tanh %329 : vector<16x96xf32>
    %336 = arith.select %17, %335, %334 : vector<16x96xi1>, vector<16x96xf32>
    %337 = vector.extract_strided_slice %336 {offsets = [0, 0], sizes = [16, 24], strides = [1, 1]} : vector<16x96xf32> to vector<16x24xf32>
    %338 = vector.extract_strided_slice %336 {offsets = [0, 24], sizes = [16, 24], strides = [1, 1]} : vector<16x96xf32> to vector<16x24xf32>
    %339 = vector.extract_strided_slice %336 {offsets = [0, 48], sizes = [16, 24], strides = [1, 1]} : vector<16x96xf32> to vector<16x24xf32>
    %340 = vector.extract_strided_slice %336 {offsets = [0, 72], sizes = [16, 24], strides = [1, 1]} : vector<16x96xf32> to vector<16x24xf32>
    %341 = arith.mulf %338, %293 : vector<16x24xf32>
    %342 = arith.mulf %337, %339 : vector<16x24xf32>
    %343 = arith.addf %341, %342 : vector<16x24xf32>
    %344 = math.tanh %343 : vector<16x24xf32>
    %345 = arith.mulf %340, %344 : vector<16x24xf32>
    %cst_102 = arith.constant dense<0.000000e+00> : vector<16x96xf32>
    %346 = tpu.matmul %345, %3, %cst_102 {dimension_numbers = #tpu.dot_dimension_numbers<[1], [0], [0], [1], [0, 0, 1, 1], [], []>} : vector<16x24xf32>, vector<24x96xf32>, vector<16x96xf32> -> vector<16x96xf32>
    %cst_103 = arith.constant dense<0.000000e+00> : vector<16x96xf32>
    %347 = tpu.matmul %316, %5, %cst_103 {dimension_numbers = #tpu.dot_dimension_numbers<[1], [0], [0], [1], [0, 0, 1, 1], [], []>} : vector<16x24xf32>, vector<24x96xf32>, vector<16x96xf32> -> vector<16x96xf32>
    %348 = arith.addf %346, %347 : vector<16x96xf32>
    %349 = vector.broadcast %7 : vector<1x96xf32> to vector<16x96xf32>
    %350 = arith.addf %348, %349 : vector<16x96xf32>
    %351 = arith.negf %350 : vector<16x96xf32>
    %352 = math.exp %351 : vector<16x96xf32>
    %cst_104 = arith.constant 1.000000e+00 : f32
    %353 = vector.broadcast %cst_104 : f32 to vector<16x96xf32>
    %354 = arith.addf %353, %352 : vector<16x96xf32>
    %355 = arith.divf %353, %354 : vector<16x96xf32>
    %356 = math.tanh %350 : vector<16x96xf32>
    %357 = arith.select %17, %356, %355 : vector<16x96xi1>, vector<16x96xf32>
    %358 = vector.extract_strided_slice %357 {offsets = [0, 0], sizes = [16, 24], strides = [1, 1]} : vector<16x96xf32> to vector<16x24xf32>
    %359 = vector.extract_strided_slice %357 {offsets = [0, 24], sizes = [16, 24], strides = [1, 1]} : vector<16x96xf32> to vector<16x24xf32>
    %360 = vector.extract_strided_slice %357 {offsets = [0, 48], sizes = [16, 24], strides = [1, 1]} : vector<16x96xf32> to vector<16x24xf32>
    %361 = vector.extract_strided_slice %357 {offsets = [0, 72], sizes = [16, 24], strides = [1, 1]} : vector<16x96xf32> to vector<16x24xf32>
    %362 = arith.mulf %359, %314 : vector<16x24xf32>
    %363 = arith.mulf %358, %360 : vector<16x24xf32>
    %364 = arith.addf %362, %363 : vector<16x24xf32>
    %365 = math.tanh %364 : vector<16x24xf32>
    %366 = arith.mulf %361, %365 : vector<16x24xf32>
    %367 = vector.broadcast %10 : vector<1x24xf32> to vector<16x24xf32>
    %368 = arith.mulf %366, %367 : vector<16x24xf32>
    %cst_105 = arith.constant dense<0.000000e+00> : vector<16xf32>
    %369 = vector.multi_reduction <add>, %368, %cst_105 [1] : vector<16x24xf32> to vector<16xf32>
    %370 = vector.shape_cast %369 : vector<16xf32> to vector<16x1xf32>
    %371 = vector.broadcast %11 : vector<1x1xf32> to vector<16x1xf32>
    %372 = arith.addf %370, %371 : vector<16x1xf32>
    %c0_106 = arith.constant 0 : index
    %c6_107 = arith.constant 6 : index
    %373 = vector.load %arg1[%c0_106, %c6_107] : memref<16x8xf32, #tpu.memory_space<vmem>>, vector<16x1xf32>
    %374 = arith.mulf %373, %372 : vector<16x1xf32>
    %c0_108 = arith.constant 0 : index
    %c6_109 = arith.constant 6 : index
    %375 = vector.load %arg5[%c0_108, %c6_109] : memref<16x8xf32, #tpu.memory_space<vmem>>, vector<16x1xf32>
    tpu.vector_store %arg5[%c0_108, %c6_109], %374 {strides = array<i32>} : memref<16x8xf32, #tpu.memory_space<vmem>>, vector<16x1xf32>,
    %c7 = arith.constant 7 : index
    %c0_110 = arith.constant 0 : index
    %c0_111 = arith.constant 0 : index
    %376 = vector.load %arg0[%c7, %c0_110, %c0_111] : memref<8x16x96xf32, #tpu.memory_space<vmem>>, vector<1x16x96xf32>
    %377 = vector.shape_cast %376 : vector<1x16x96xf32> to vector<16x96xf32>
    %cst_112 = arith.constant dense<0.000000e+00> : vector<16x96xf32>
    %378 = tpu.matmul %345, %1, %cst_112 {dimension_numbers = #tpu.dot_dimension_numbers<[1], [0], [0], [1], [0, 0, 1, 1], [], []>} : vector<16x24xf32>, vector<24x96xf32>, vector<16x96xf32> -> vector<16x96xf32>
    %379 = arith.addf %377, %378 : vector<16x96xf32>
    %380 = arith.negf %379 : vector<16x96xf32>
    %381 = math.exp %380 : vector<16x96xf32>
    %cst_113 = arith.constant 1.000000e+00 : f32
    %382 = vector.broadcast %cst_113 : f32 to vector<16x96xf32>
    %383 = arith.addf %382, %381 : vector<16x96xf32>
    %384 = arith.divf %382, %383 : vector<16x96xf32>
    %385 = math.tanh %379 : vector<16x96xf32>
    %386 = arith.select %17, %385, %384 : vector<16x96xi1>, vector<16x96xf32>
    %387 = vector.extract_strided_slice %386 {offsets = [0, 0], sizes = [16, 24], strides = [1, 1]} : vector<16x96xf32> to vector<16x24xf32>
    %388 = vector.extract_strided_slice %386 {offsets = [0, 24], sizes = [16, 24], strides = [1, 1]} : vector<16x96xf32> to vector<16x24xf32>
    %389 = vector.extract_strided_slice %386 {offsets = [0, 48], sizes = [16, 24], strides = [1, 1]} : vector<16x96xf32> to vector<16x24xf32>
    %390 = vector.extract_strided_slice %386 {offsets = [0, 72], sizes = [16, 24], strides = [1, 1]} : vector<16x96xf32> to vector<16x24xf32>
    %391 = arith.mulf %388, %343 : vector<16x24xf32>
    %392 = arith.mulf %387, %389 : vector<16x24xf32>
    %393 = arith.addf %391, %392 : vector<16x24xf32>
    %394 = math.tanh %393 : vector<16x24xf32>
    %395 = arith.mulf %390, %394 : vector<16x24xf32>
    %cst_114 = arith.constant dense<0.000000e+00> : vector<16x96xf32>
    %396 = tpu.matmul %395, %3, %cst_114 {dimension_numbers = #tpu.dot_dimension_numbers<[1], [0], [0], [1], [0, 0, 1, 1], [], []>} : vector<16x24xf32>, vector<24x96xf32>, vector<16x96xf32> -> vector<16x96xf32>
    %cst_115 = arith.constant dense<0.000000e+00> : vector<16x96xf32>
    %397 = tpu.matmul %366, %5, %cst_115 {dimension_numbers = #tpu.dot_dimension_numbers<[1], [0], [0], [1], [0, 0, 1, 1], [], []>} : vector<16x24xf32>, vector<24x96xf32>, vector<16x96xf32> -> vector<16x96xf32>
    %398 = arith.addf %396, %397 : vector<16x96xf32>
    %399 = vector.broadcast %7 : vector<1x96xf32> to vector<16x96xf32>
    %400 = arith.addf %398, %399 : vector<16x96xf32>
    %401 = arith.negf %400 : vector<16x96xf32>
    %402 = math.exp %401 : vector<16x96xf32>
    %cst_116 = arith.constant 1.000000e+00 : f32
    %403 = vector.broadcast %cst_116 : f32 to vector<16x96xf32>
    %404 = arith.addf %403, %402 : vector<16x96xf32>
    %405 = arith.divf %403, %404 : vector<16x96xf32>
    %406 = math.tanh %400 : vector<16x96xf32>
    %407 = arith.select %17, %406, %405 : vector<16x96xi1>, vector<16x96xf32>
    %408 = vector.extract_strided_slice %407 {offsets = [0, 0], sizes = [16, 24], strides = [1, 1]} : vector<16x96xf32> to vector<16x24xf32>
    %409 = vector.extract_strided_slice %407 {offsets = [0, 24], sizes = [16, 24], strides = [1, 1]} : vector<16x96xf32> to vector<16x24xf32>
    %410 = vector.extract_strided_slice %407 {offsets = [0, 48], sizes = [16, 24], strides = [1, 1]} : vector<16x96xf32> to vector<16x24xf32>
    %411 = vector.extract_strided_slice %407 {offsets = [0, 72], sizes = [16, 24], strides = [1, 1]} : vector<16x96xf32> to vector<16x24xf32>
    %412 = arith.mulf %409, %364 : vector<16x24xf32>
    %413 = arith.mulf %408, %410 : vector<16x24xf32>
    %414 = arith.addf %412, %413 : vector<16x24xf32>
    %415 = math.tanh %414 : vector<16x24xf32>
    %416 = arith.mulf %411, %415 : vector<16x24xf32>
    %417 = vector.broadcast %10 : vector<1x24xf32> to vector<16x24xf32>
    %418 = arith.mulf %416, %417 : vector<16x24xf32>
    %cst_117 = arith.constant dense<0.000000e+00> : vector<16xf32>
    %419 = vector.multi_reduction <add>, %418, %cst_117 [1] : vector<16x24xf32> to vector<16xf32>
    %420 = vector.shape_cast %419 : vector<16xf32> to vector<16x1xf32>
    %421 = vector.broadcast %11 : vector<1x1xf32> to vector<16x1xf32>
    %422 = arith.addf %420, %421 : vector<16x1xf32>
    %c0_118 = arith.constant 0 : index
    %c7_119 = arith.constant 7 : index
    %423 = vector.load %arg1[%c0_118, %c7_119] : memref<16x8xf32, #tpu.memory_space<vmem>>, vector<16x1xf32>
    %424 = arith.mulf %423, %422 : vector<16x1xf32>
    %c0_120 = arith.constant 0 : index
    %c7_121 = arith.constant 7 : index
    %425 = vector.load %arg5[%c0_120, %c7_121] : memref<16x8xf32, #tpu.memory_space<vmem>>, vector<16x1xf32>
    tpu.vector_store %arg5[%c0_120, %c7_121], %424 {strides = array<i32>} : memref<16x8xf32, #tpu.memory_space<vmem>>, vector<16x1xf32>,
    %c0_122 = arith.constant 0 : index
    %c0_123 = arith.constant 0 : index
    %c0_124 = arith.constant 0 : index
    %426 = vector.load %arg6[%c0_122, %c0_123, %c0_124] : memref<4x16x24xf32, #tpu.memory_space<vmem>>, vector<1x16x24xf32>
    %427 = vector.shape_cast %426 : vector<1x16x24xf32> to vector<16x24xf32>
    %428 = vector.shape_cast %395 : vector<16x24xf32> to vector<1x16x24xf32>
    tpu.vector_store %arg6[%c0_122, %c0_123, %c0_124], %428 {strides = array<i32>} : memref<4x16x24xf32, #tpu.memory_space<vmem>>, vector<1x16x24xf32>,
    %c1_125 = arith.constant 1 : index
    %c0_126 = arith.constant 0 : index
    %c0_127 = arith.constant 0 : index
    %429 = vector.load %arg6[%c1_125, %c0_126, %c0_127] : memref<4x16x24xf32, #tpu.memory_space<vmem>>, vector<1x16x24xf32>
    %430 = vector.shape_cast %429 : vector<1x16x24xf32> to vector<16x24xf32>
    %431 = vector.shape_cast %416 : vector<16x24xf32> to vector<1x16x24xf32>
    tpu.vector_store %arg6[%c1_125, %c0_126, %c0_127], %431 {strides = array<i32>} : memref<4x16x24xf32, #tpu.memory_space<vmem>>, vector<1x16x24xf32>,
    %c2_128 = arith.constant 2 : index
    %c0_129 = arith.constant 0 : index
    %c0_130 = arith.constant 0 : index
    %432 = vector.load %arg6[%c2_128, %c0_129, %c0_130] : memref<4x16x24xf32, #tpu.memory_space<vmem>>, vector<1x16x24xf32>
    %433 = vector.shape_cast %432 : vector<1x16x24xf32> to vector<16x24xf32>
    %434 = vector.shape_cast %393 : vector<16x24xf32> to vector<1x16x24xf32>
    tpu.vector_store %arg6[%c2_128, %c0_129, %c0_130], %434 {strides = array<i32>} : memref<4x16x24xf32, #tpu.memory_space<vmem>>, vector<1x16x24xf32>,
    %c3_131 = arith.constant 3 : index
    %c0_132 = arith.constant 0 : index
    %c0_133 = arith.constant 0 : index
    %435 = vector.load %arg6[%c3_131, %c0_132, %c0_133] : memref<4x16x24xf32, #tpu.memory_space<vmem>>, vector<1x16x24xf32>
    %436 = vector.shape_cast %435 : vector<1x16x24xf32> to vector<16x24xf32>
    %437 = vector.shape_cast %414 : vector<16x24xf32> to vector<1x16x24xf32>
    tpu.vector_store %arg6[%c3_131, %c0_132, %c0_133], %437 {strides = array<i32>} : memref<4x16x24xf32, #tpu.memory_space<vmem>>, vector<1x16x24xf32>,
    return
  }
}

</mosaic_0001>

<bundles_post_ra>
// kernel: lstm_l2o_forward.1
= control target key start
LH: loop header
LB: loop body
LE: loop exit
PB: predicated region body
PF: predicated region fallthrough
CT: control target
= control target key end

     0   :  { %vm54_vm0 = vcmask 195584   ;;  %s4046_s7 = smov 24   ;;  %v36_v18 = vlaneseq  ;;  %s4047_s16 = smov 80   ;;  %vm467_vm4 = vcmask 7168   ;;  %vm852_vm5 = vcmask 15368   ;;  %s4982_s3 = inlined_call_operand.vmem [shape: f32[3,24,96], index: 3, kind: input, shape index: {}]   ;;  %s4983_s2 = inlined_call_operand.vmem [shape: f32[4,16,24], index: 2, kind: input, shape index: {}]   ;;  %s4984_s0 = inlined_call_operand.vmem [shape: f32[8,16,96], index: 0, kind: input, shape index: {}]   ;;  %s4985_s4 = inlined_call_operand.vmem [shape: f32[2,1,96], index: 4, kind: input, shape index: {}]   ;;  %s4986_s6 = inlined_call_operand.vmem [shape: f32[4,16,24], index: 6, kind: output, shape index: {1}]   ;;  %s4987_s1 = inlined_call_operand.vmem [shape: f32[16,8], index: 1, kind: input, shape index: {}]   ;;  %s4988_s5 = inlined_call_operand.vmem [shape: f32[16,8], index: 5, kind: output, shape index: {0}]  }
   0x1   :  { %v22_v0 = vld [vmem:[%s4982_s3] sm:$0xff]  ;;  %v23_v1 = vld [vmem:[%s4982_s3 + $0x8] sm:$0xff]  ;;  %v4111_v5 = vld [vmem:[%s4982_s3 + $0x10] sm:$0xff]  ;;  %s4048_s8 = smov 48   ;;  %s4049_s11 = smov 56   ;;  %vm1237_vm6 = vcmask 23568  }
   0x2   :  { %v4100_v2 = vpack.c.bf16 %v23_v1, %v22_v0  ;;  %v41_v3 = vld [vmem:[%s4983_s2] sm:$0xff]  ;;  %v3220_v6 = vld [vmem:[%s4983_s2 + $0x28] sm:$0xff]  ;;  %v37_v21 = vand.u32 127, %v36_v18  ;;  %v3213_v41 = vld [vmem:[%s4982_s3 + $0x30] sm:$0xff]  ;;  %s4050_s17 = smov 72   ;;  %s4053_s25 = smov 106  }
   0x3   :  { %v3219_v4 = vld [vmem:[%s4983_s2 + $0x20] sm:$0xff]  ;;  %3451 = vmatprep.mubr.msk.f32.mxu1 %vm54_vm0, %v41_v3  ;;  %v42_v7 = vld [vmem:[%s4983_s2 + $0x8] sm:$0xff]  ;;  %v3214_v42 = vld [vmem:[%s4982_s3 + $0x38] sm:$0xff]  ;;  %s4054_s30 = smov 107   ;;  %s4055_s9 = smov 108   ;;  %vm1622_vm7 = vcmask 31768  }
   0x4   :  { %156 = vrot.lane.b32.xlu1 %v3219_v4, %s4046_s7  ;;  %3662 = vmatprep.subr.bf16.mxu1 %v4100_v2  ;;  %v53_v8 = vld [vmem:[%s4984_s0 + $0x8] sm:$0xff]  ;;  %v52_v9 = vld [vmem:[%s4984_s0] sm:$0xff]  ;;  %vm38_vm1 = vcmp.ge.s32.totalorder %v37_v21, 48  ;;  %vm39_vm2 = vcmp.lt.s32.totalorder %v37_v21, 72  ;;  %v4161_v43 = vpack.c.bf16 %v3214_v42, %v3213_v41  ;;  %v3217_v44 = vld [vmem:[%s4983_s2 + $0x10] sm:$0xff]  ;;  %s4057_s10 = smov 110  }
   0x5   :  { %3674 = vmatprep.subr.bf16.mxu0 %v4100_v2  ;;  %3664 = vmatpush3.bf16.msra.mxu1 %v4100_v2  ;;  %vm4137_vm3 = vmand %vm38_vm1, %vm39_vm2  ;;  %v4169_v45 = vld [vmem:[%s4982_s3 + $0x40] sm:$0xff]  ;;  %v3210_v46 = vld [vmem:[%s4982_s3 + $0x18] sm:$0xff]  ;;  %s4058_s12 = smov 111   ;;  %vm2007_vm8 = vcmask 39968   ;;  %vm2392_vm9 = vcmask 48168   ;;  %vm2777_vm10 = vcmask 56368  }
   0x6   :  { %3676 = vmatpush3.bf16.msra.mxu0 %v4100_v2  ;;  %3449 = vmatprep.subr.mxu1 %v4111_v5  ;;  %v3211_v47 = vld [vmem:[%s4982_s3 + $0x20] sm:$0xff]  ;;  %v3218_v50 = vld [vmem:[%s4983_s2 + $0x18] sm:$0xff]  ;;  %v4192_v51 = vld [vmem:[%s4982_s3 + $0x28] sm:$0xff]  ;;  %vm3162_vm11 = vcmask 64568  }
   0x7   :  { %3476 = vmatprep.subr.mxu0 %v4111_v5  ;;  %v4182_v48 = vpack.c.bf16 %v3211_v47, %v3210_v46  ;;  %v4218_v59 = vld [vmem:[%s4985_s4] ss:$0 sm:$0xff]  ;;  %v3236_v60 = vld [vmem:[%s4984_s0 + $0x18] sm:$0xff]  ;;  %v3235_v61 = vld [vmem:[%s4984_s0 + $0x10] sm:$0xff] }
   0x8   :  { %158 = vrot.lane.b32.xlu1 %v3220_v6, %s4046_s7 }
   0x9   :  { %3450 = vmatpush3.msra.mxu1 %v4111_v5 }
   0xa   :  { %3477 = vmatpush3.msra.mxu0 %v4111_v5  ;;  %3452 = vmatmul.mubr.msk.f32.vlgmr.msra.gmra.mrb[0].mxu1 %vm54_vm0, %v42_v7 }
   0xb   :  { %3460 = vmatprep.mubr.msk.f32.mxu1 %vm54_vm0, %v3217_v44  ;;  %3666 = vmatprep.subr.bf16.mxu1 %v4161_v43 }
   0xc   :  { %3678 = vmatprep.subr.bf16.mxu0 %v4161_v43  ;;  %3668 = vmatpush3.bf16.msra.mxu1 %v4161_v43 }
   0xd   :  { %3458 = vmatprep.subr.mxu1 %v4169_v45 }
  0x10   :  { %3459 = vmatpush3.msra.mxu1 %v4169_v45 }
  0x11   :  { %3670 = vmatprep.subr.bf16.mxu1 %v4182_v48  ;;  %3461 = vmatmul.mubr.msk.f32.vlgmr.msra.gmra.mrb[2].mxu1 %vm54_vm0, %v3218_v50 }
  0x12   :  { %3672 = vmatpush3.bf16.msra.mxu1 %v4182_v48 }
  0x13   :  { %3467 = vmatprep.subr.mxu1 %v4192_v51 }
  0x16   :  { %3468 = vmatpush3.msra.mxu1 %v4192_v51 }
  0x17   :  { %3686 = vmatprep.subr.bf16.mxu1 %v4100_v2 }
  0x76   :  { %v157_v33 = vpop.permute.xlu1 %156 }
  0x7a   :  { %v159_v35 = vpop.permute.xlu1 %158 }
  0xdd   :  { %v3453_v10 = vpop.f32.mrb[0].mxu1 }
  0xde   :  { %v137_v11 = vadd.f32 %v3453_v10, %v53_v8  ;;  %v127_v12 = vpop.f32.mrb[1].mxu1 }
  0xdf   :  { %v136_v13 = vadd.f32 %v127_v12, %v52_v9 }
  0xe0   :  { %v3226_v14 = vmul.f32 -1.442695, %v137_v11 }
  0xe1   :  { %v3225_v15 = vmul.f32 -1.442695, %v136_v13 }
  0xe2   :  { %3786 = vpow2.f32 %v3226_v14 }
  0xe3   :  { %3788 = vpow2.f32 %v3225_v15 }
  0xe4   :  { %3790 = vtanh.f32 %v136_v13 }
  0xec   :  { %v3787_v16 = vpop.eup %3786 }
  0xed   :  { %v3789_v17 = vpop.eup %3788  ;;  %v145_v19 = vadd.f32 1.0, %v3787_v16 }
  0xee   :  { %v144_v20 = vadd.f32 1.0, %v3789_v17  ;;  %v3791_v23 = vpop.eup %3790 }
  0xf0   :  { %3792 = vrcp.f32 %v144_v20 }
  0xf1   :  { %3794 = vrcp.f32 %v145_v19 }
  0xf2   :  { %3796 = vtanh.f32 %v137_v11 }
  0xfa   :  { %v3793_v24 = vpop.eup %3792 }
  0xfb   :  { %v152_v25 = vsel %vm4137_vm3, %v3791_v23, %v3793_v24  ;;  %v3795_v26 = vpop.eup %3794 }
  0xfc   :  { %166 = vrot.lane.b32.xlu0 %v152_v25, %s4047_s16  ;;  %v3797_v27 = vpop.eup %3796  ;;  %v162_v34 = vmul.f32 %v157_v33, %v152_v25  ;;  %v3222_v33 = vld [vmem:[%s4983_s2 + $0x38] sm:$0xff] }
  0xfd   :  { %v153_v28 = vsel %vm4137_vm3, %v3797_v27, %v3795_v26 }
  0xfe   :  { %v163_v38 = vmul.f32 %v159_v35, %v153_v28 }
 0x100   :  { %168 = vrot.lane.b32.xlu0 %v153_v28, %s4047_s16 }
 0x16e   :  { %v167_v29 = vpop.permute.xlu0 %166 }
 0x16f   :  { %v172_v30 = vmul.f32 %v167_v29, %v152_v25 }
 0x171   :  { %176 = vrot.lane.b32.xlu0 %v172_v30, %s4046_s7 }
 0x172   :  { %v169_v31 = vpop.permute.xlu0 %168 }
 0x173   :  { %v173_v32 = vmul.f32 %v169_v31, %v153_v28 }
 0x175   :  { %178 = vrot.lane.b32.xlu1 %v173_v32, %s4046_s7 }
 0x1e3   :  { %v177_v36 = vpop.permute.xlu0 %176 }
 0x1e4   :  { %v4149_v37 = vadd.f32 %v177_v36, %v162_v34  ;;  %v3221_v34 = vld [vmem:[%s4983_s2 + $0x30] sm:$0xff] }
 0x1e6   :  { %3798 = vtanh.f32 %v4149_v37 }
 0x1e7   :  { %v179_v39 = vpop.permute.xlu1 %178 }
 0x1e8   :  { %v4152_v40 = vadd.f32 %v179_v39, %v163_v38 }
 0x1ea   :  { %3800 = vtanh.f32 %v4152_v40 }
 0x1f0   :  { %v3799_v49 = vpop.eup %3798 }
 0x1f1   :  { %188 = vrot.lane.b32.xlu0 %v3799_v49, %s4048_s8 }
 0x1f4   :  { %v3801_v52 = vpop.eup %3800 }
 0x1f5   :  { %190 = vrot.lane.b32.xlu1 %v3801_v52, %s4048_s8 }
 0x263   :  { %v189_v53 = vpop.permute.xlu0 %188 }
 0x264   :  { %v194_v54 = vmul.f32 %v189_v53, %v152_v25 }
 0x266   :  { %279 = vrot.lane.b32.xlu0 %v194_v54, %s4049_s11 }
 0x267   :  { %v191_v55 = vpop.permute.xlu1 %190 }
 0x268   :  { %v195_v56 = vmul.f32 %v191_v55, %v153_v28 }
 0x26a   :  { %281 = vrot.lane.b32.xlu1 %v195_v56, %s4049_s11 }
 0x2d8   :  { %v280_v57 = vpop.permute.xlu0 %279 }
 0x2d9   :  { %3469 = vmatprep.mubr.msk.f32.mxu1 %vm54_vm0, %v280_v57  ;;  %3478 = vmatprep.mubr.msk.f32.mxu0 %vm54_vm0, %v280_v57 }
 0x2dc   :  { %v282_v58 = vpop.permute.xlu1 %281 }
 0x2dd   :  { %3470 = vmatmul.mubr.msk.f32.vlgmr.msra.gmra.mrb[2].mxu1 %vm54_vm0, %v282_v58  ;;  %3479 = vmatmul.mubr.msk.f32.vlgmr.msra.gmra.mrb[0].mxu0 %vm54_vm0, %v282_v58 }
 0x2de   :  { %3680 = vmatpush3.bf16.msra.mxu0 %v4161_v43  ;;  %3688 = vmatpush3.bf16.msra.mxu1 %v4100_v2 }
 0x2df   :  { %3485 = vmatprep.subr.mxu0 %v4169_v45  ;;  %3503 = vmatprep.subr.mxu1 %v4111_v5 }
 0x2e2   :  { %3486 = vmatpush3.msra.mxu0 %v4169_v45  ;;  %3504 = vmatpush3.msra.mxu1 %v4111_v5 }
 0x2e3   :  { %3682 = vmatprep.subr.bf16.mxu0 %v4182_v48  ;;  %3690 = vmatprep.subr.bf16.mxu1 %v4161_v43 }
 0x3b0   :  { %v3471_v62 = vpop.f32.mrb[2].mxu1  ;;  %v3480_v63 = vpop.f32.mrb[0].mxu0 }
 0x3b1   :  { %v369_v0 = vadd.f32 %v3471_v62, %v4218_v59  ;;  %v549_v1 = vadd.f32 %v3480_v63, %v3236_v60  ;;  %v353_v3 = vpop.f32.mrb[3].mxu1  ;;  %v539_v4 = vpop.f32.mrb[1].mxu0 }
 0x3b2   :  { %v368_v6 = vadd.f32 %v4218_v59, %v353_v3  ;;  %v548_v7 = vadd.f32 %v3235_v61, %v539_v4 }
 0x3b3   :  { %v3233_v8 = vmul.f32 -1.442695, %v369_v0  ;;  %v3240_v9 = vmul.f32 -1.442695, %v549_v1 }
 0x3b4   :  { %v3232_v10 = vmul.f32 -1.442695, %v368_v6  ;;  %v3239_v11 = vmul.f32 -1.442695, %v548_v7 }
 0x3b5   :  { %3802 = vpow2.f32 %v3233_v8 }
 0x3b6   :  { %3804 = vpow2.f32 %v3240_v9 }
 0x3b7   :  { %3806 = vpow2.f32 %v3232_v10 }
 0x3b8   :  { %3808 = vpow2.f32 %v3239_v11 }
 0x3b9   :  { %3810 = vtanh.f32 %v369_v0 }
 0x3ba   :  { %3812 = vtanh.f32 %v368_v6 }
 0x3bf   :  { %v3803_v12 = vpop.eup %3802 }
 0x3c0   :  { %v3805_v13 = vpop.eup %3804  ;;  %v377_v14 = vadd.f32 1.0, %v3803_v12 }
 0x3c1   :  { %v3807_v15 = vpop.eup %3806  ;;  %v557_v16 = vadd.f32 1.0, %v3805_v13 }
 0x3c2   :  { %3814 = vrcp.f32 %v377_v14  ;;  %v376_v17 = vadd.f32 1.0, %v3807_v15  ;;  %v3809_v18 = vpop.eup %3808 }
 0x3c3   :  { %3816 = vrcp.f32 %v557_v16  ;;  %v556_v19 = vadd.f32 1.0, %v3809_v18  ;;  %v3811_v20 = vpop.eup %3810  ;;  %v3248_v16 = vld [vmem:[%s4984_s0 + $0x28] sm:$0xff] }
 0x3c4   :  { %3818 = vrcp.f32 %v376_v17  ;;  %v3813_v21 = vpop.eup %3812  ;;  %v3247_v17 = vld [vmem:[%s4984_s0 + $0x20] sm:$0xff] }
 0x3c5   :  { %3820 = vtanh.f32 %v549_v1 }
 0x3c6   :  { %3822 = vrcp.f32 %v556_v19 }
 0x3c7   :  { %3824 = vtanh.f32 %v548_v7 }
 0x3cc   :  { %v3815_v23 = vpop.eup %3814 }
 0x3cd   :  { %v3817_v24 = vpop.eup %3816  ;;  %v385_v25 = vsel %vm4137_vm3, %v3811_v20, %v3815_v23 }
 0x3ce   :  { %v3819_v26 = vpop.eup %3818  ;;  %400 = vrot.lane.b32.xlu1 %v385_v25, %s4047_s16 }
 0x3cf   :  { %v3821_v27 = vpop.eup %3820  ;;  %v384_v28 = vsel %vm4137_vm3, %v3813_v21, %v3819_v26 }
 0x3d0   :  { %v3823_v29 = vpop.eup %3822  ;;  %398 = vrot.lane.b32.xlu0 %v384_v28, %s4047_s16  ;;  %v565_v30 = vsel %vm4137_vm3, %v3821_v27, %v3817_v24 }
 0x3d1   :  { %v3825_v31 = vpop.eup %3824  ;;  %v567_v57 = vmul.f32 %v565_v30, %v4152_v40 }
 0x3d2   :  { %572 = vrot.lane.b32.xlu1 %v565_v30, %s4047_s16  ;;  %v564_v32 = vsel %vm4137_vm3, %v3825_v31, %v3823_v29 }
 0x3d3   :  { %v566_v61 = vmul.f32 %v564_v32, %v4149_v37 }
 0x3d4   :  { %570 = vrot.lane.b32.xlu0 %v564_v32, %s4047_s16 }
 0x3d6   :  { %390 = vrot.lane.b32.xlu1 %v3222_v33, %s4046_s7 }
 0x3d8   :  { %388 = vrot.lane.b32.xlu0 %v3221_v34, %s4046_s7 }
 0x440   :  { %v401_v35 = vpop.permute.xlu1 %400 }
 0x441   :  { %v405_v36 = vmul.f32 %v401_v35, %v385_v25 }
 0x442   :  { %v399_v38 = vpop.permute.xlu0 %398 }
 0x443   :  { %v404_v39 = vmul.f32 %v399_v38, %v384_v28  ;;  %410 = vrot.lane.b32.xlu1 %v405_v36, %s4046_s7 }
 0x444   :  { %v573_v41 = vpop.permute.xlu1 %572 }
 0x445   :  { %v577_v42 = vmul.f32 %v573_v41, %v565_v30  ;;  %408 = vrot.lane.b32.xlu0 %v404_v39, %s4046_s7 }
 0x446   :  { %v571_v44 = vpop.permute.xlu0 %570 }
 0x447   :  { %v576_v46 = vmul.f32 %v571_v44, %v564_v32  ;;  %582 = vrot.lane.b32.xlu1 %v577_v42, %s4046_s7 }
 0x448   :  { %v391_v47 = vpop.permute.xlu1 %390 }
 0x449   :  { %580 = vrot.lane.b32.xlu0 %v576_v46, %s4046_s7  ;;  %v395_v50 = vmul.f32 %v391_v47, %v385_v25 }
 0x44a   :  { %v389_v49 = vpop.permute.xlu0 %388 }
 0x44b   :  { %v394_v53 = vmul.f32 %v389_v49, %v384_v28 }
 0x4b5   :  { %v411_v52 = vpop.permute.xlu1 %410 }
 0x4b6   :  { %v4252_v54 = vadd.f32 %v411_v52, %v395_v50 }
 0x4b7   :  { %v409_v55 = vpop.permute.xlu0 %408 }
 0x4b8   :  { %3826 = vtanh.f32 %v4252_v54  ;;  %v4255_v56 = vadd.f32 %v409_v55, %v394_v53 }
 0x4b9   :  { %v583_v58 = vpop.permute.xlu1 %582 }
 0x4ba   :  { %3828 = vtanh.f32 %v4255_v56  ;;  %v4259_v60 = vadd.f32 %v583_v58, %v567_v57 }
 0x4bb   :  { %v581_v62 = vpop.permute.xlu0 %580 }
 0x4bc   :  { %3830 = vtanh.f32 %v4259_v60  ;;  %v4263_v63 = vadd.f32 %v581_v62, %v566_v61 }
 0x4be   :  { %3832 = vtanh.f32 %v4263_v63 }
 0x4c2   :  { %v3827_v0 = vpop.eup %3826 }
 0x4c3   :  { %422 = vrot.lane.b32.xlu1 %v3827_v0, %s4048_s8 }
 0x4c4   :  { %v3829_v1 = vpop.eup %3828 }
 0x4c5   :  { %420 = vrot.lane.b32.xlu0 %v3829_v1, %s4048_s8 }
 0x4c6   :  { %v3831_v40 = vpop.eup %3830 }
 0x4c7   :  { %594 = vrot.lane.b32.xlu1 %v3831_v40, %s4048_s8 }
 0x4c8   :  { %v3833_v3 = vpop.eup %3832 }
 0x4c9   :  { %592 = vrot.lane.b32.xlu0 %v3833_v3, %s4048_s8 }
 0x535   :  { %v423_v37 = vpop.permute.xlu1 %422 }
 0x536   :  { %v4270_v4 = vmul.f32 %v423_v37, %v385_v25 }
 0x537   :  { %v421_v6 = vpop.permute.xlu0 %420 }
 0x538   :  { %v4272_v7 = vmul.f32 %v421_v6, %v384_v28  ;;  %604 = vrot.lane.b32.xlu1 %v4270_v4, %s4049_s11 }
 0x539   :  { %v595_v8 = vpop.permute.xlu1 %594 }
 0x53a   :  { %v599_v9 = vmul.f32 %v595_v8, %v565_v30  ;;  %602 = vrot.lane.b32.xlu0 %v4272_v7, %s4049_s11 }
 0x53b   :  { %v593_v10 = vpop.permute.xlu0 %592 }
 0x53c   :  { %v598_v11 = vmul.f32 %v593_v10, %v564_v32  ;;  %689 = vrot.lane.b32.xlu1 %v599_v9, %s4049_s11 }
 0x53e   :  { %687 = vrot.lane.b32.xlu0 %v598_v11, %s4049_s11 }
 0x5aa   :  { %v605_v12 = vpop.permute.xlu1 %604 }
 0x5ac   :  { %v603_v13 = vpop.permute.xlu0 %602 }
 0x5ad   :  { %3487 = vmatprep.mubr.msk.f32.mxu0 %vm54_vm0, %v603_v13 }
 0x5ae   :  { %3488 = vmatmul.mubr.msk.f32.vlgmr.msra.gmra.mrb[2].mxu0 %vm54_vm0, %v605_v12  ;;  %v690_v15 = vpop.permute.xlu1 %689 }
 0x5af   :  { %3684 = vmatpush3.bf16.msra.mxu0 %v4182_v48 }
 0x5b0   :  { %v688_v14 = vpop.permute.xlu0 %687  ;;  %3494 = vmatprep.subr.mxu0 %v4192_v51 }
 0x5b1   :  { %3496 = vmatprep.mubr.msk.f32.mxu0 %vm54_vm0, %v688_v14  ;;  %3505 = vmatprep.mubr.msk.f32.mxu1 %vm54_vm0, %v688_v14 }
 0x5b2   :  { %3506 = vmatmul.mubr.msk.f32.vlgmr.msra.gmra.mrb[4].mxu1 %vm54_vm0, %v690_v15 }
 0x5b3   :  { %3495 = vmatpush3.msra.mxu0 %v4192_v51  ;;  %3692 = vmatpush3.bf16.msra.mxu1 %v4161_v43 }
 0x5b4   :  { %3512 = vmatprep.subr.mxu1 %v4169_v45  ;;  %3698 = vmatprep.subr.bf16.mxu0 %v4100_v2 }
 0x5b6   :  { %3497 = vmatmul.mubr.msk.f32.vlgmr.msra.gmra.mrb[2].mxu0 %vm54_vm0, %v690_v15 }
 0x5b7   :  { %3513 = vmatpush3.msra.mxu1 %v4169_v45  ;;  %3700 = vmatpush3.bf16.msra.mxu0 %v4100_v2 }
 0x5b8   :  { %3694 = vmatprep.subr.bf16.mxu1 %v4182_v48  ;;  %3530 = vmatprep.subr.mxu0 %v4111_v5 }
 0x5bb   :  { %3531 = vmatpush3.msra.mxu0 %v4111_v5 }
 0x5bc   :  { %3702 = vmatprep.subr.bf16.mxu0 %v4161_v43 }
 0x685   :  { %v3507_v18 = vpop.f32.mrb[4].mxu1 }
 0x686   :  { %v934_v19 = vadd.f32 %v3507_v18, %v3248_v16  ;;  %v924_v20 = vpop.f32.mrb[5].mxu1 }
 0x687   :  { %v933_v21 = vadd.f32 %v3247_v17, %v924_v20 }
 0x688   :  { %v3252_v23 = vmul.f32 -1.442695, %v934_v19 }
 0x689   :  { %v3251_v24 = vmul.f32 -1.442695, %v933_v21  ;;  %v3498_v25 = vpop.f32.mrb[2].mxu0 }
 0x68a   :  { %v771_v26 = vadd.f32 %v3498_v25, %v4218_v59  ;;  %v761_v27 = vpop.f32.mrb[3].mxu0  ;;  %3834 = vpow2.f32 %v3252_v23 }
 0x68b   :  { %v770_v28 = vadd.f32 %v4218_v59, %v761_v27  ;;  %3836 = vpow2.f32 %v3251_v24 }
 0x68c   :  { %v3246_v29 = vmul.f32 -1.442695, %v771_v26 }
 0x68d   :  { %v3245_v30 = vmul.f32 -1.442695, %v770_v28 }
 0x68e   :  { %3838 = vpow2.f32 %v3246_v29 }
 0x68f   :  { %3840 = vpow2.f32 %v3245_v30 }
 0x690   :  { %3842 = vtanh.f32 %v771_v26 }
 0x691   :  { %3844 = vtanh.f32 %v770_v28 }
 0x694   :  { %v3835_v31 = vpop.eup %3834 }
 0x695   :  { %v3837_v32 = vpop.eup %3836  ;;  %v942_v35 = vadd.f32 1.0, %v3835_v31 }
 0x696   :  { %v941_v38 = vadd.f32 1.0, %v3837_v32 }
 0x698   :  { %v3839_v33 = vpop.eup %3838 }
 0x699   :  { %v3841_v34 = vpop.eup %3840  ;;  %v779_v36 = vadd.f32 1.0, %v3839_v33  ;;  %v3260_v33 = vld [vmem:[%s4984_s0 + $0x38] sm:$0xff] }
 0x69a   :  { %v778_v39 = vadd.f32 1.0, %v3841_v34  ;;  %v3843_v41 = vpop.eup %3842  ;;  %v3259_v34 = vld [vmem:[%s4984_s0 + $0x30] sm:$0xff] }
 0x69b   :  { %3846 = vrcp.f32 %v779_v36  ;;  %v3845_v42 = vpop.eup %3844 }
 0x69c   :  { %3848 = vrcp.f32 %v778_v39 }
 0x69d   :  { %3850 = vrcp.f32 %v942_v35 }
 0x69e   :  { %3852 = vrcp.f32 %v941_v38 }
 0x69f   :  { %3854 = vtanh.f32 %v934_v19 }
 0x6a0   :  { %3856 = vtanh.f32 %v933_v21 }
 0x6a5   :  { %v3847_v44 = vpop.eup %3846 }
 0x6a6   :  { %v3849_v46 = vpop.eup %3848  ;;  %v787_v47 = vsel %vm4137_vm3, %v3843_v41, %v3847_v44 }
 0x6a7   :  { %v3851_v49 = vpop.eup %3850  ;;  %794 = vrot.lane.b32.xlu1 %v787_v47, %s4047_s16  ;;  %v786_v50 = vsel %vm4137_vm3, %v3845_v42, %v3849_v46  ;;  %v789_v8 = vmul.f32 %v787_v47, %v4252_v54 }
 0x6a8   :  { %v3853_v52 = vpop.eup %3852  ;;  %792 = vrot.lane.b32.xlu0 %v786_v50, %s4047_s16  ;;  %v788_v10 = vmul.f32 %v786_v50, %v4255_v56 }
 0x6a9   :  { %v3855_v53 = vpop.eup %3854 }
 0x6aa   :  { %v3857_v55 = vpop.eup %3856  ;;  %v950_v57 = vsel %vm4137_vm3, %v3855_v53, %v3851_v49 }
 0x6ab   :  { %957 = vrot.lane.b32.xlu1 %v950_v57, %s4047_s16  ;;  %v949_v58 = vsel %vm4137_vm3, %v3857_v55, %v3853_v52  ;;  %v952_v14 = vmul.f32 %v950_v57, %v4259_v60 }
 0x6ac   :  { %955 = vrot.lane.b32.xlu0 %v949_v58, %s4047_s16  ;;  %v951_v16 = vmul.f32 %v949_v58, %v4263_v63 }
 0x719   :  { %v795_v61 = vpop.permute.xlu1 %794 }
 0x71a   :  { %v799_v62 = vmul.f32 %v795_v61, %v787_v47  ;;  %v793_v0 = vpop.permute.xlu0 %792 }
 0x71b   :  { %v798_v1 = vmul.f32 %v793_v0, %v786_v50 }
 0x71c   :  { %804 = vrot.lane.b32.xlu1 %v799_v62, %s4046_s7 }
 0x71d   :  { %v958_v40 = vpop.permute.xlu1 %957  ;;  %802 = vrot.lane.b32.xlu0 %v798_v1, %s4046_s7 }
 0x71e   :  { %v962_v3 = vmul.f32 %v958_v40, %v950_v57  ;;  %v956_v37 = vpop.permute.xlu0 %955 }
 0x71f   :  { %v961_v6 = vmul.f32 %v956_v37, %v949_v58 }
 0x720   :  { %967 = vrot.lane.b32.xlu1 %v962_v3, %s4046_s7 }
 0x721   :  { %965 = vrot.lane.b32.xlu0 %v961_v6, %s4046_s7 }
 0x78e   :  { %v805_v9 = vpop.permute.xlu1 %804 }
 0x78f   :  { %v4324_v11 = vadd.f32 %v805_v9, %v789_v8  ;;  %v803_v12 = vpop.permute.xlu0 %802 }
 0x790   :  { %v4326_v13 = vadd.f32 %v803_v12, %v788_v10 }
 0x791   :  { %3858 = vtanh.f32 %v4324_v11 }
 0x792   :  { %3860 = vtanh.f32 %v4326_v13  ;;  %v968_v15 = vpop.permute.xlu1 %967 }
 0x793   :  { %v4332_v17 = vadd.f32 %v968_v15, %v952_v14  ;;  %v966_v54 = vpop.permute.xlu0 %965 }
 0x794   :  { %v4334_v18 = vadd.f32 %v966_v54, %v951_v16 }
 0x795   :  { %3862 = vtanh.f32 %v4332_v17 }
 0x796   :  { %3864 = vtanh.f32 %v4334_v18 }
 0x79b   :  { %v3859_v56 = vpop.eup %3858 }
 0x79c   :  { %v3861_v19 = vpop.eup %3860  ;;  %816 = vrot.lane.b32.xlu1 %v3859_v56, %s4048_s8 }
 0x79d   :  { %814 = vrot.lane.b32.xlu0 %v3861_v19, %s4048_s8 }
 0x79f   :  { %v3863_v60 = vpop.eup %3862 }
 0x7a0   :  { %v3865_v20 = vpop.eup %3864  ;;  %979 = vrot.lane.b32.xlu1 %v3863_v60, %s4048_s8 }
 0x7a1   :  { %977 = vrot.lane.b32.xlu0 %v3865_v20, %s4048_s8 }
 0x80e   :  { %v817_v63 = vpop.permute.xlu1 %816 }
 0x80f   :  { %v4342_v21 = vmul.f32 %v817_v63, %v787_v47  ;;  %v815_v23 = vpop.permute.xlu0 %814 }
 0x810   :  { %v4344_v24 = vmul.f32 %v815_v23, %v786_v50 }
 0x811   :  { %989 = vrot.lane.b32.xlu1 %v4342_v21, %s4049_s11 }
 0x812   :  { %v980_v25 = vpop.permute.xlu1 %979  ;;  %987 = vrot.lane.b32.xlu0 %v4344_v24, %s4049_s11 }
 0x813   :  { %v984_v26 = vmul.f32 %v980_v25, %v950_v57  ;;  %v978_v27 = vpop.permute.xlu0 %977 }
 0x814   :  { %v983_v28 = vmul.f32 %v978_v27, %v949_v58 }
 0x815   :  { %1074 = vrot.lane.b32.xlu1 %v984_v26, %s4049_s11 }
 0x816   :  { %1072 = vrot.lane.b32.xlu0 %v983_v28, %s4049_s11 }
 0x883   :  { %v990_v29 = vpop.permute.xlu1 %989 }
 0x884   :  { %v988_v30 = vpop.permute.xlu0 %987 }
 0x885   :  { %3514 = vmatprep.mubr.msk.f32.mxu1 %vm54_vm0, %v988_v30 }
 0x886   :  { %3515 = vmatmul.mubr.msk.f32.vlgmr.msra.gmra.mrb[6].mxu1 %vm54_vm0, %v990_v29 }
 0x887   :  { %3696 = vmatpush3.bf16.msra.mxu1 %v4182_v48  ;;  %v1075_v32 = vpop.permute.xlu1 %1074 }
 0x888   :  { %v1073_v31 = vpop.permute.xlu0 %1072  ;;  %3521 = vmatprep.subr.mxu1 %v4192_v51 }
 0x889   :  { %3523 = vmatprep.mubr.msk.f32.mxu1 %vm54_vm0, %v1073_v31  ;;  %3532 = vmatprep.mubr.msk.f32.mxu0 %vm54_vm0, %v1073_v31 }
 0x88a   :  { %3533 = vmatmul.mubr.msk.f32.vlgmr.msra.gmra.mrb[4].mxu0 %vm54_vm0, %v1075_v32 }
 0x88b   :  { %3522 = vmatpush3.msra.mxu1 %v4192_v51  ;;  %3704 = vmatpush3.bf16.msra.mxu0 %v4161_v43 }
 0x88c   :  { %3539 = vmatprep.subr.mxu0 %v4169_v45  ;;  %3710 = vmatprep.subr.bf16.mxu1 %v4100_v2 }
 0x88e   :  { %3524 = vmatmul.mubr.msk.f32.vlgmr.msra.gmra.mrb[6].mxu1 %vm54_vm0, %v1075_v32 }
 0x88f   :  { %3540 = vmatpush3.msra.mxu0 %v4169_v45  ;;  %3712 = vmatpush3.bf16.msra.mxu1 %v4100_v2 }
 0x890   :  { %3706 = vmatprep.subr.bf16.mxu0 %v4182_v48  ;;  %3557 = vmatprep.subr.mxu1 %v4111_v5 }
 0x893   :  { %3558 = vmatpush3.msra.mxu1 %v4111_v5 }
 0x894   :  { %3714 = vmatprep.subr.bf16.mxu1 %v4161_v43 }
 0x95d   :  { %v3534_v35 = vpop.f32.mrb[4].mxu0 }
 0x95e   :  { %v1319_v36 = vadd.f32 %v3534_v35, %v3260_v33  ;;  %v1309_v38 = vpop.f32.mrb[5].mxu0 }
 0x95f   :  { %v1318_v39 = vadd.f32 %v3259_v34, %v1309_v38 }
 0x960   :  { %v3264_v41 = vmul.f32 -1.442695, %v1319_v36 }
 0x961   :  { %v3263_v42 = vmul.f32 -1.442695, %v1318_v39  ;;  %v3525_v44 = vpop.f32.mrb[6].mxu1 }
 0x962   :  { %v1156_v46 = vadd.f32 %v3525_v44, %v4218_v59  ;;  %v1146_v47 = vpop.f32.mrb[7].mxu1  ;;  %3866 = vpow2.f32 %v3264_v41 }
 0x963   :  { %v1155_v49 = vadd.f32 %v4218_v59, %v1146_v47  ;;  %3868 = vpow2.f32 %v3263_v42 }
 0x964   :  { %v3258_v50 = vmul.f32 -1.442695, %v1156_v46 }
 0x965   :  { %v3257_v52 = vmul.f32 -1.442695, %v1155_v49 }
 0x966   :  { %3870 = vpow2.f32 %v3258_v50 }
 0x967   :  { %3872 = vpow2.f32 %v3257_v52 }
 0x968   :  { %3874 = vtanh.f32 %v1156_v46 }
 0x969   :  { %3876 = vtanh.f32 %v1155_v49 }
 0x96c   :  { %v3867_v53 = vpop.eup %3866 }
 0x96d   :  { %v3869_v55 = vpop.eup %3868  ;;  %v1327_v61 = vadd.f32 1.0, %v3867_v53 }
 0x96e   :  { %v1326_v0 = vadd.f32 1.0, %v3869_v55 }
 0x970   :  { %v3871_v57 = vpop.eup %3870 }
 0x971   :  { %v3873_v58 = vpop.eup %3872  ;;  %v1164_v62 = vadd.f32 1.0, %v3871_v57 }
 0x972   :  { %v1163_v1 = vadd.f32 1.0, %v3873_v58  ;;  %v3875_v40 = vpop.eup %3874 }
 0x973   :  { %3878 = vrcp.f32 %v1164_v62  ;;  %v3877_v3 = vpop.eup %3876  ;;  %v3271_v62 = vld [vmem:[%s4984_s0 + $0x40] sm:$0xff] }
 0x974   :  { %3880 = vrcp.f32 %v1163_v1 }
 0x975   :  { %3882 = vrcp.f32 %v1327_v61  ;;  %v3272_v61 = vld [vmem:[%s4984_s0 + $0x48] sm:$0xff] }
 0x976   :  { %3884 = vrcp.f32 %v1326_v0 }
 0x977   :  { %3886 = vtanh.f32 %v1319_v36 }
 0x978   :  { %3888 = vtanh.f32 %v1318_v39 }
 0x97d   :  { %v3879_v37 = vpop.eup %3878 }
 0x97e   :  { %v3881_v6 = vpop.eup %3880  ;;  %v1172_v8 = vsel %vm4137_vm3, %v3875_v40, %v3879_v37 }
 0x97f   :  { %v3883_v9 = vpop.eup %3882  ;;  %1179 = vrot.lane.b32.xlu1 %v1172_v8, %s4047_s16  ;;  %v1171_v10 = vsel %vm4137_vm3, %v3877_v3, %v3881_v6  ;;  %v1174_v27 = vmul.f32 %v1172_v8, %v4324_v11 }
 0x980   :  { %v3885_v12 = vpop.eup %3884  ;;  %1177 = vrot.lane.b32.xlu0 %v1171_v10, %s4047_s16  ;;  %v1173_v29 = vmul.f32 %v1171_v10, %v4326_v13 }
 0x981   :  { %v3887_v14 = vpop.eup %3886 }
 0x982   :  { %v3889_v15 = vpop.eup %3888  ;;  %v1335_v16 = vsel %vm4137_vm3, %v3887_v14, %v3883_v9 }
 0x983   :  { %1342 = vrot.lane.b32.xlu1 %v1335_v16, %s4047_s16  ;;  %v1334_v54 = vsel %vm4137_vm3, %v3889_v15, %v3885_v12  ;;  %v1337_v33 = vmul.f32 %v1335_v16, %v4332_v17 }
 0x984   :  { %1340 = vrot.lane.b32.xlu0 %v1334_v54, %s4047_s16  ;;  %v1336_v35 = vmul.f32 %v1334_v54, %v4334_v18 }
 0x9f1   :  { %v1180_v56 = vpop.permute.xlu1 %1179 }
 0x9f2   :  { %v1184_v19 = vmul.f32 %v1180_v56, %v1172_v8  ;;  %v1178_v60 = vpop.permute.xlu0 %1177 }
 0x9f3   :  { %v1183_v20 = vmul.f32 %v1178_v60, %v1171_v10 }
 0x9f4   :  { %1189 = vrot.lane.b32.xlu1 %v1184_v19, %s4046_s7 }
 0x9f5   :  { %v1343_v63 = vpop.permute.xlu1 %1342  ;;  %1187 = vrot.lane.b32.xlu0 %v1183_v20, %s4046_s7 }
 0x9f6   :  { %v1347_v23 = vmul.f32 %v1343_v63, %v1335_v16  ;;  %v1341_v25 = vpop.permute.xlu0 %1340 }
 0x9f7   :  { %v1346_v26 = vmul.f32 %v1341_v25, %v1334_v54 }
 0x9f8   :  { %1352 = vrot.lane.b32.xlu1 %v1347_v23, %s4046_s7 }
 0x9f9   :  { %1350 = vrot.lane.b32.xlu0 %v1346_v26, %s4046_s7 }
 0xa66   :  { %v1190_v28 = vpop.permute.xlu1 %1189 }
 0xa67   :  { %v4396_v30 = vadd.f32 %v1190_v28, %v1174_v27  ;;  %v1188_v31 = vpop.permute.xlu0 %1187 }
 0xa68   :  { %v4398_v32 = vadd.f32 %v1188_v31, %v1173_v29 }
 0xa69   :  { %3890 = vtanh.f32 %v4396_v30 }
 0xa6a   :  { %3892 = vtanh.f32 %v4398_v32  ;;  %v1353_v34 = vpop.permute.xlu1 %1352 }
 0xa6b   :  { %v4404_v36 = vadd.f32 %v1353_v34, %v1337_v33  ;;  %v1351_v11 = vpop.permute.xlu0 %1350 }
 0xa6c   :  { %v4406_v38 = vadd.f32 %v1351_v11, %v1336_v35 }
 0xa6d   :  { %3894 = vtanh.f32 %v4404_v36 }
 0xa6e   :  { %3896 = vtanh.f32 %v4406_v38 }
 0xa73   :  { %v3891_v13 = vpop.eup %3890 }
 0xa74   :  { %v3893_v39 = vpop.eup %3892  ;;  %1201 = vrot.lane.b32.xlu1 %v3891_v13, %s4048_s8 }
 0xa75   :  { %1199 = vrot.lane.b32.xlu0 %v3893_v39, %s4048_s8 }
 0xa77   :  { %v3895_v17 = vpop.eup %3894 }
 0xa78   :  { %v3897_v41 = vpop.eup %3896  ;;  %1364 = vrot.lane.b32.xlu1 %v3895_v17, %s4048_s8 }
 0xa79   :  { %1362 = vrot.lane.b32.xlu0 %v3897_v41, %s4048_s8 }
 0xae6   :  { %v1202_v18 = vpop.permute.xlu1 %1201 }
 0xae7   :  { %v4414_v42 = vmul.f32 %v1202_v18, %v1172_v8  ;;  %v1200_v44 = vpop.permute.xlu0 %1199 }
 0xae8   :  { %v4416_v46 = vmul.f32 %v1200_v44, %v1171_v10 }
 0xae9   :  { %1374 = vrot.lane.b32.xlu1 %v4414_v42, %s4049_s11 }
 0xaea   :  { %v1365_v47 = vpop.permute.xlu1 %1364  ;;  %1372 = vrot.lane.b32.xlu0 %v4416_v46, %s4049_s11 }
 0xaeb   :  { %v1369_v49 = vmul.f32 %v1365_v47, %v1335_v16  ;;  %v1363_v50 = vpop.permute.xlu0 %1362 }
 0xaec   :  { %v1368_v52 = vmul.f32 %v1363_v50, %v1334_v54 }
 0xaed   :  { %1459 = vrot.lane.b32.xlu1 %v1369_v49, %s4049_s11 }
 0xaee   :  { %1457 = vrot.lane.b32.xlu0 %v1368_v52, %s4049_s11 }
 0xb5b   :  { %v1375_v53 = vpop.permute.xlu1 %1374 }
 0xb5c   :  { %v1373_v55 = vpop.permute.xlu0 %1372 }
 0xb5d   :  { %3541 = vmatprep.mubr.msk.f32.mxu0 %vm54_vm0, %v1373_v55 }
 0xb5e   :  { %3542 = vmatmul.mubr.msk.f32.vlgmr.msra.gmra.mrb[6].mxu0 %vm54_vm0, %v1375_v53 }
 0xb5f   :  { %3708 = vmatpush3.bf16.msra.mxu0 %v4182_v48  ;;  %v1460_v58 = vpop.permute.xlu1 %1459 }
 0xb60   :  { %v1458_v57 = vpop.permute.xlu0 %1457  ;;  %3548 = vmatprep.subr.mxu0 %v4192_v51 }
 0xb61   :  { %3550 = vmatprep.mubr.msk.f32.mxu0 %vm54_vm0, %v1458_v57  ;;  %3559 = vmatprep.mubr.msk.f32.mxu1 %vm54_vm0, %v1458_v57 }
 0xb62   :  { %3560 = vmatmul.mubr.msk.f32.vlgmr.msra.gmra.mrb[8].mxu1 %vm54_vm0, %v1460_v58 }
 0xb63   :  { %3549 = vmatpush3.msra.mxu0 %v4192_v51  ;;  %3716 = vmatpush3.bf16.msra.mxu1 %v4161_v43 }
 0xb64   :  { %3566 = vmatprep.subr.mxu1 %v4169_v45  ;;  %3722 = vmatprep.subr.bf16.mxu0 %v4100_v2 }
 0xb66   :  { %3551 = vmatmul.mubr.msk.f32.vlgmr.msra.gmra.mrb[6].mxu0 %vm54_vm0, %v1460_v58 }
 0xb67   :  { %3567 = vmatpush3.msra.mxu1 %v4169_v45  ;;  %3724 = vmatpush3.bf16.msra.mxu0 %v4100_v2 }
 0xb68   :  { %3718 = vmatprep.subr.bf16.mxu1 %v4182_v48  ;;  %3584 = vmatprep.subr.mxu0 %v4111_v5 }
 0xb6b   :  { %3585 = vmatpush3.msra.mxu0 %v4111_v5 }
 0xb6c   :  { %3726 = vmatprep.subr.bf16.mxu0 %v4161_v43 }
 0xc35   :  { %v3561_v0 = vpop.f32.mrb[8].mxu1 }
 0xc36   :  { %v1704_v45 = vadd.f32 %v3561_v0, %v3272_v61  ;;  %v1694_v1 = vpop.f32.mrb[9].mxu1 }
 0xc37   :  { %v1703_v40 = vadd.f32 %v3271_v62, %v1694_v1 }
 0xc38   :  { %v3276_v3 = vmul.f32 -1.442695, %v1704_v45 }
 0xc39   :  { %v3275_v37 = vmul.f32 -1.442695, %v1703_v40  ;;  %v3552_v6 = vpop.f32.mrb[6].mxu0 }
 0xc3a   :  { %v1541_v8 = vadd.f32 %v3552_v6, %v4218_v59  ;;  %v1531_v5 = vpop.f32.mrb[7].mxu0  ;;  %3898 = vpow2.f32 %v3276_v3 }
 0xc3b   :  { %v1540_v9 = vadd.f32 %v4218_v59, %v1531_v5  ;;  %3900 = vpow2.f32 %v3275_v37 }
 0xc3c   :  { %v3270_v10 = vmul.f32 -1.442695, %v1541_v8 }
 0xc3d   :  { %v3269_v12 = vmul.f32 -1.442695, %v1540_v9 }
 0xc3e   :  { %3902 = vpow2.f32 %v3270_v10 }
 0xc3f   :  { %3904 = vpow2.f32 %v3269_v12 }
 0xc40   :  { %3906 = vtanh.f32 %v1541_v8 }
 0xc41   :  { %3908 = vtanh.f32 %v1540_v9 }
 0xc44   :  { %v3899_v14 = vpop.eup %3898 }
 0xc45   :  { %v3901_v15 = vpop.eup %3900  ;;  %v1712_v56 = vadd.f32 1.0, %v3899_v14 }
 0xc46   :  { %v1711_v60 = vadd.f32 1.0, %v3901_v15 }
 0xc48   :  { %v3903_v16 = vpop.eup %3902 }
 0xc49   :  { %v3905_v54 = vpop.eup %3904  ;;  %v1549_v19 = vadd.f32 1.0, %v3903_v16 }
 0xc4a   :  { %v1548_v20 = vadd.f32 1.0, %v3905_v54  ;;  %v3907_v63 = vpop.eup %3906 }
 0xc4b   :  { %3910 = vrcp.f32 %v1549_v19  ;;  %v3909_v23 = vpop.eup %3908  ;;  %v3284_v19 = vld [vmem:[%s4984_s0 + $0x58] sm:$0xff] }
 0xc4c   :  { %3912 = vrcp.f32 %v1548_v20 }
 0xc4d   :  { %3914 = vrcp.f32 %v1712_v56  ;;  %v4508_v56 = vld [vmem:[%s4982_s3 + $0x40] sm:$0xff] }
 0xc4e   :  { %3916 = vrcp.f32 %v1711_v60  ;;  %v3283_v60 = vld [vmem:[%s4984_s0 + $0x50] sm:$0xff] }
 0xc4f   :  { %3918 = vtanh.f32 %v1704_v45 }
 0xc50   :  { %3920 = vtanh.f32 %v1703_v40 }
 0xc55   :  { %v3911_v25 = vpop.eup %3910 }
 0xc56   :  { %v3913_v26 = vpop.eup %3912  ;;  %v1557_v27 = vsel %vm4137_vm3, %v3907_v63, %v3911_v25 }
 0xc57   :  { %v3915_v28 = vpop.eup %3914  ;;  %1564 = vrot.lane.b32.xlu1 %v1557_v27, %s4047_s16  ;;  %v1556_v29 = vsel %vm4137_vm3, %v3909_v23, %v3913_v26  ;;  %v1559_v50 = vmul.f32 %v1557_v27, %v4396_v30 }
 0xc58   :  { %v3917_v31 = vpop.eup %3916  ;;  %1562 = vrot.lane.b32.xlu0 %v1556_v29, %s4047_s16  ;;  %v1558_v53 = vmul.f32 %v1556_v29, %v4398_v32 }
 0xc59   :  { %v3919_v33 = vpop.eup %3918 }
 0xc5a   :  { %v3921_v34 = vpop.eup %3920  ;;  %v1720_v35 = vsel %vm4137_vm3, %v3919_v33, %v3915_v28 }
 0xc5b   :  { %1727 = vrot.lane.b32.xlu1 %v1720_v35, %s4047_s16  ;;  %v1719_v11 = vsel %vm4137_vm3, %v3921_v34, %v3917_v31  ;;  %v1722_v61 = vmul.f32 %v1720_v35, %v4404_v36 }
 0xc5c   :  { %1725 = vrot.lane.b32.xlu0 %v1719_v11, %s4047_s16  ;;  %v1721_v0 = vmul.f32 %v1719_v11, %v4406_v38 }
 0xcc9   :  { %v1565_v13 = vpop.permute.xlu1 %1564 }
 0xcca   :  { %v1569_v39 = vmul.f32 %v1565_v13, %v1557_v27  ;;  %v1563_v17 = vpop.permute.xlu0 %1562 }
 0xccb   :  { %v1568_v41 = vmul.f32 %v1563_v17, %v1556_v29 }
 0xccc   :  { %1574 = vrot.lane.b32.xlu1 %v1569_v39, %s4046_s7 }
 0xccd   :  { %v1728_v18 = vpop.permute.xlu1 %1727  ;;  %1572 = vrot.lane.b32.xlu0 %v1568_v41, %s4046_s7 }
 0xcce   :  { %v1732_v44 = vmul.f32 %v1728_v18, %v1720_v35  ;;  %v1726_v47 = vpop.permute.xlu0 %1725 }
 0xccf   :  { %v1731_v49 = vmul.f32 %v1726_v47, %v1719_v11 }
 0xcd0   :  { %1737 = vrot.lane.b32.xlu1 %v1732_v44, %s4046_s7 }
 0xcd1   :  { %1735 = vrot.lane.b32.xlu0 %v1731_v49, %s4046_s7 }
 0xd3e   :  { %v1575_v52 = vpop.permute.xlu1 %1574 }
 0xd3f   :  { %v4468_v55 = vadd.f32 %v1575_v52, %v1559_v50  ;;  %v1573_v57 = vpop.permute.xlu0 %1572 }
 0xd40   :  { %v4470_v58 = vadd.f32 %v1573_v57, %v1558_v53 }
 0xd41   :  { %3922 = vtanh.f32 %v4468_v55 }
 0xd42   :  { %3924 = vtanh.f32 %v4470_v58  ;;  %v1738_v62 = vpop.permute.xlu1 %1737 }
 0xd43   :  { %v4476_v45 = vadd.f32 %v1738_v62, %v1722_v61  ;;  %v1736_v30 = vpop.permute.xlu0 %1735 }
 0xd44   :  { %v4478_v1 = vadd.f32 %v1736_v30, %v1721_v0 }
 0xd45   :  { %3926 = vtanh.f32 %v4476_v45 }
 0xd46   :  { %3928 = vtanh.f32 %v4478_v1 }
 0xd4b   :  { %v3923_v32 = vpop.eup %3922 }
 0xd4c   :  { %v3925_v40 = vpop.eup %3924  ;;  %1586 = vrot.lane.b32.xlu1 %v3923_v32, %s4048_s8 }
 0xd4d   :  { %1584 = vrot.lane.b32.xlu0 %v3925_v40, %s4048_s8 }
 0xd4f   :  { %v3927_v36 = vpop.eup %3926 }
 0xd50   :  { %v3929_v3 = vpop.eup %3928  ;;  %1749 = vrot.lane.b32.xlu1 %v3927_v36, %s4048_s8 }
 0xd51   :  { %1747 = vrot.lane.b32.xlu0 %v3929_v3, %s4048_s8 }
 0xdbe   :  { %v1587_v38 = vpop.permute.xlu1 %1586 }
 0xdbf   :  { %v4486_v37 = vmul.f32 %v1587_v38, %v1557_v27  ;;  %v1585_v6 = vpop.permute.xlu0 %1584 }
 0xdc0   :  { %v4488_v8 = vmul.f32 %v1585_v6, %v1556_v29 }
 0xdc1   :  { %1759 = vrot.lane.b32.xlu1 %v4486_v37, %s4049_s11 }
 0xdc2   :  { %v1750_v5 = vpop.permute.xlu1 %1749  ;;  %1757 = vrot.lane.b32.xlu0 %v4488_v8, %s4049_s11 }
 0xdc3   :  { %v1754_v9 = vmul.f32 %v1750_v5, %v1720_v35  ;;  %v1748_v10 = vpop.permute.xlu0 %1747 }
 0xdc4   :  { %v1753_v12 = vmul.f32 %v1748_v10, %v1719_v11 }
 0xdc5   :  { %1844 = vrot.lane.b32.xlu1 %v1754_v9, %s4049_s11 }
 0xdc6   :  { %1842 = vrot.lane.b32.xlu0 %v1753_v12, %s4049_s11 }
 0xe33   :  { %v1760_v14 = vpop.permute.xlu1 %1759 }
 0xe34   :  { %v1758_v15 = vpop.permute.xlu0 %1757 }
 0xe35   :  { %3568 = vmatprep.mubr.msk.f32.mxu1 %vm54_vm0, %v1758_v15 }
 0xe36   :  { %3569 = vmatmul.mubr.msk.f32.vlgmr.msra.gmra.mrb[10].mxu1 %vm54_vm0, %v1760_v14 }
 0xe37   :  { %3720 = vmatpush3.bf16.msra.mxu1 %v4182_v48  ;;  %v1845_v54 = vpop.permute.xlu1 %1844 }
 0xe38   :  { %v1843_v16 = vpop.permute.xlu0 %1842  ;;  %3575 = vmatprep.subr.mxu1 %v4192_v51 }
 0xe39   :  { %3577 = vmatprep.mubr.msk.f32.mxu1 %vm54_vm0, %v1843_v16  ;;  %3586 = vmatprep.mubr.msk.f32.mxu0 %vm54_vm0, %v1843_v16 }
 0xe3a   :  { %3587 = vmatmul.mubr.msk.f32.vlgmr.msra.gmra.mrb[8].mxu0 %vm54_vm0, %v1845_v54 }
 0xe3b   :  { %3576 = vmatpush3.msra.mxu1 %v4192_v51  ;;  %3728 = vmatpush3.bf16.msra.mxu0 %v4161_v43  ;;  %v4519_v51 = vld [vmem:[%s4982_s3 + $0x10] sm:$0xff] }
 0xe3c   :  { %3593 = vmatprep.subr.mxu0 %v4508_v56  ;;  %3734 = vmatprep.subr.bf16.mxu1 %v4100_v2 }
 0xe3e   :  { %3578 = vmatmul.mubr.msk.f32.vlgmr.msra.gmra.mrb[10].mxu1 %vm54_vm0, %v1845_v54 }
 0xe3f   :  { %3594 = vmatpush3.msra.mxu0 %v4508_v56  ;;  %3736 = vmatpush3.bf16.msra.mxu1 %v4100_v2 }
 0xe40   :  { %3730 = vmatprep.subr.bf16.mxu0 %v4182_v48  ;;  %3611 = vmatprep.subr.mxu1 %v4519_v51 }
 0xe43   :  { %3612 = vmatpush3.msra.mxu1 %v4519_v51 }
 0xe44   :  { %3738 = vmatprep.subr.bf16.mxu1 %v4161_v43 }
 0xf0d   :  { %v3588_v20 = vpop.f32.mrb[8].mxu0 }
 0xf0e   :  { %v2089_v63 = vadd.f32 %v3588_v20, %v3284_v19  ;;  %v2079_v23 = vpop.f32.mrb[9].mxu0 }
 0xf0f   :  { %v2088_v25 = vadd.f32 %v3283_v60, %v2079_v23 }
 0xf10   :  { %v3288_v26 = vmul.f32 -1.442695, %v2089_v63 }
 0xf11   :  { %v3287_v27 = vmul.f32 -1.442695, %v2088_v25  ;;  %v3579_v28 = vpop.f32.mrb[10].mxu1 }
 0xf12   :  { %v1926_v29 = vadd.f32 %v3579_v28, %v4218_v59  ;;  %v1916_v31 = vpop.f32.mrb[11].mxu1  ;;  %3930 = vpow2.f32 %v3288_v26 }
 0xf13   :  { %v1925_v33 = vadd.f32 %v4218_v59, %v1916_v31  ;;  %3932 = vpow2.f32 %v3287_v27 }
 0xf14   :  { %v3282_v34 = vmul.f32 -1.442695, %v1926_v29 }
 0xf15   :  { %v3281_v35 = vmul.f32 -1.442695, %v1925_v33 }
 0xf16   :  { %3934 = vpow2.f32 %v3282_v34 }
 0xf17   :  { %3936 = vpow2.f32 %v3281_v35 }
 0xf18   :  { %3938 = vtanh.f32 %v1926_v29 }
 0xf19   :  { %3940 = vtanh.f32 %v1925_v33 }
 0xf1c   :  { %v3931_v11 = vpop.eup %3930 }
 0xf1d   :  { %v3933_v13 = vpop.eup %3932  ;;  %v2097_v41 = vadd.f32 1.0, %v3931_v11 }
 0xf1e   :  { %v2096_v44 = vadd.f32 1.0, %v3933_v13 }
 0xf20   :  { %v3935_v39 = vpop.eup %3934 }
 0xf21   :  { %v3937_v17 = vpop.eup %3936  ;;  %v1934_v18 = vadd.f32 1.0, %v3935_v39 }
 0xf22   :  { %v1933_v47 = vadd.f32 1.0, %v3937_v17  ;;  %v3939_v59 = vpop.eup %3938 }
 0xf23   :  { %3942 = vrcp.f32 %v1934_v18  ;;  %v3941_v49 = vpop.eup %3940  ;;  %v4584_v18 = vld [vmem:[%s4982_s3 + $0x28] sm:$0xff] }
 0xf24   :  { %3944 = vrcp.f32 %v1933_v47  ;;  %v3296_v47 = vld [vmem:[%s4984_s0 + $0x68] sm:$0xff] }
 0xf25   :  { %3946 = vrcp.f32 %v2097_v41 }
 0xf26   :  { %3948 = vrcp.f32 %v2096_v44 }
 0xf27   :  { %3950 = vtanh.f32 %v2089_v63 }
 0xf28   :  { %3952 = vtanh.f32 %v2088_v25 }
 0xf2d   :  { %v3943_v50 = vpop.eup %3942 }
 0xf2e   :  { %v3945_v52 = vpop.eup %3944  ;;  %v1942_v53 = vsel %vm4137_vm3, %v3939_v59, %v3943_v50  ;;  %v3295_v59 = vld [vmem:[%s4984_s0 + $0x60] sm:$0xff] }
 0xf2f   :  { %v3947_v57 = vpop.eup %3946  ;;  %1949 = vrot.lane.b32.xlu1 %v1942_v53, %s4047_s16  ;;  %v1941_v61 = vsel %vm4137_vm3, %v3941_v49, %v3945_v52  ;;  %v1944_v14 = vmul.f32 %v1942_v53, %v4468_v55 }
 0xf30   :  { %v3949_v62 = vpop.eup %3948  ;;  %1947 = vrot.lane.b32.xlu0 %v1941_v61, %s4047_s16  ;;  %v1943_v16 = vmul.f32 %v1941_v61, %v4470_v58 }
 0xf31   :  { %v3951_v0 = vpop.eup %3950 }
 0xf32   :  { %v3953_v30 = vpop.eup %3952  ;;  %v2105_v32 = vsel %vm4137_vm3, %v3951_v0, %v3947_v57 }
 0xf33   :  { %2112 = vrot.lane.b32.xlu1 %v2105_v32, %s4047_s16  ;;  %v2104_v40 = vsel %vm4137_vm3, %v3953_v30, %v3949_v62  ;;  %v2107_v20 = vmul.f32 %v2105_v32, %v4476_v45 }
 0xf34   :  { %2110 = vrot.lane.b32.xlu0 %v2104_v40, %s4047_s16  ;;  %v2106_v23 = vmul.f32 %v2104_v40, %v4478_v1 }
 0xfa1   :  { %v1950_v36 = vpop.permute.xlu1 %1949 }
 0xfa2   :  { %v1954_v3 = vmul.f32 %v1950_v36, %v1942_v53  ;;  %v1948_v38 = vpop.permute.xlu0 %1947 }
 0xfa3   :  { %v1953_v6 = vmul.f32 %v1948_v38, %v1941_v61 }
 0xfa4   :  { %1959 = vrot.lane.b32.xlu1 %v1954_v3, %s4046_s7 }
 0xfa5   :  { %v2113_v5 = vpop.permute.xlu1 %2112  ;;  %1957 = vrot.lane.b32.xlu0 %v1953_v6, %s4046_s7 }
 0xfa6   :  { %v2117_v9 = vmul.f32 %v2113_v5, %v2105_v32  ;;  %v2111_v10 = vpop.permute.xlu0 %2110 }
 0xfa7   :  { %v2116_v12 = vmul.f32 %v2111_v10, %v2104_v40 }
 0xfa8   :  { %2122 = vrot.lane.b32.xlu1 %v2117_v9, %s4046_s7 }
 0xfa9   :  { %2120 = vrot.lane.b32.xlu0 %v2116_v12, %s4046_s7 }
0x1016   :  { %v1960_v15 = vpop.permute.xlu1 %1959 }
0x1017   :  { %v4550_v54 = vadd.f32 %v1960_v15, %v1944_v14  ;;  %v1958_v19 = vpop.permute.xlu0 %1957 }
0x1018   :  { %v4552_v60 = vadd.f32 %v1958_v19, %v1943_v16 }
0x1019   :  { %3954 = vtanh.f32 %v4550_v54 }
0x101a   :  { %3956 = vtanh.f32 %v4552_v60  ;;  %v2123_v63 = vpop.permute.xlu1 %2122 }
0x101b   :  { %v4558_v25 = vadd.f32 %v2123_v63, %v2107_v20  ;;  %v2121_v55 = vpop.permute.xlu0 %2120 }
0x101c   :  { %v4560_v26 = vadd.f32 %v2121_v55, %v2106_v23 }
0x101d   :  { %3958 = vtanh.f32 %v4558_v25 }
0x101e   :  { %3960 = vtanh.f32 %v4560_v26 }
0x1023   :  { %v3955_v58 = vpop.eup %3954 }
0x1024   :  { %v3957_v27 = vpop.eup %3956  ;;  %1971 = vrot.lane.b32.xlu1 %v3955_v58, %s4048_s8 }
0x1025   :  { %1969 = vrot.lane.b32.xlu0 %v3957_v27, %s4048_s8 }
0x1027   :  { %v3959_v45 = vpop.eup %3958 }
0x1028   :  { %v3961_v28 = vpop.eup %3960  ;;  %2134 = vrot.lane.b32.xlu1 %v3959_v45, %s4048_s8 }
0x1029   :  { %2132 = vrot.lane.b32.xlu0 %v3961_v28, %s4048_s8 }
0x1096   :  { %v1972_v1 = vpop.permute.xlu1 %1971 }
0x1097   :  { %v4568_v29 = vmul.f32 %v1972_v1, %v1942_v53  ;;  %v1970_v31 = vpop.permute.xlu0 %1969 }
0x1098   :  { %v4570_v33 = vmul.f32 %v1970_v31, %v1941_v61 }
0x1099   :  { %2144 = vrot.lane.b32.xlu1 %v4568_v29, %s4049_s11 }
0x109a   :  { %v2135_v34 = vpop.permute.xlu1 %2134  ;;  %2142 = vrot.lane.b32.xlu0 %v4570_v33, %s4049_s11 }
0x109b   :  { %v2139_v35 = vmul.f32 %v2135_v34, %v2105_v32  ;;  %v2133_v11 = vpop.permute.xlu0 %2132 }
0x109c   :  { %v2138_v13 = vmul.f32 %v2133_v11, %v2104_v40 }
0x109d   :  { %2229 = vrot.lane.b32.xlu1 %v2139_v35, %s4049_s11 }
0x109e   :  { %2227 = vrot.lane.b32.xlu0 %v2138_v13, %s4049_s11 }
0x110b   :  { %v2145_v39 = vpop.permute.xlu1 %2144 }
0x110c   :  { %v2143_v17 = vpop.permute.xlu0 %2142 }
0x110d   :  { %3595 = vmatprep.mubr.msk.f32.mxu0 %vm54_vm0, %v2143_v17 }
0x110e   :  { %3596 = vmatmul.mubr.msk.f32.vlgmr.msra.gmra.mrb[10].mxu0 %vm54_vm0, %v2145_v39 }
0x110f   :  { %3732 = vmatpush3.bf16.msra.mxu0 %v4182_v48  ;;  %v2230_v44 = vpop.permute.xlu1 %2229 }
0x1110   :  { %v2228_v41 = vpop.permute.xlu0 %2227  ;;  %3602 = vmatprep.subr.mxu0 %v4584_v18 }
0x1111   :  { %3604 = vmatprep.mubr.msk.f32.mxu0 %vm54_vm0, %v2228_v41  ;;  %3613 = vmatprep.mubr.msk.f32.mxu1 %vm54_vm0, %v2228_v41 }
0x1112   :  { %3614 = vmatmul.mubr.msk.f32.vlgmr.msra.gmra.mrb[12].mxu1 %vm54_vm0, %v2230_v44 }
0x1113   :  { %3603 = vmatpush3.msra.mxu0 %v4584_v18  ;;  %3740 = vmatpush3.bf16.msra.mxu1 %v4161_v43 }
0x1114   :  { %3620 = vmatprep.subr.mxu1 %v4508_v56  ;;  %3746 = vmatprep.subr.bf16.mxu0 %v4100_v2 }
0x1116   :  { %3605 = vmatmul.mubr.msk.f32.vlgmr.msra.gmra.mrb[10].mxu0 %vm54_vm0, %v2230_v44 }
0x1117   :  { %3621 = vmatpush3.msra.mxu1 %v4508_v56  ;;  %3748 = vmatpush3.bf16.msra.mxu0 %v4100_v2 }
0x1118   :  { %3742 = vmatprep.subr.bf16.mxu1 %v4182_v48  ;;  %3638 = vmatprep.subr.mxu0 %v4519_v51 }
0x111b   :  { %3639 = vmatpush3.msra.mxu0 %v4519_v51  ;;  %v4610_v51 = vld [vmem:[%s4985_s4] ss:$0 sm:$0xff] }
0x111c   :  { %3750 = vmatprep.subr.bf16.mxu0 %v4161_v43 }
0x11e5   :  { %v3615_v49 = vpop.f32.mrb[12].mxu1 }
0x11e6   :  { %v2474_v50 = vadd.f32 %v3615_v49, %v3296_v47  ;;  %v2464_v52 = vpop.f32.mrb[13].mxu1 }
0x11e7   :  { %v2473_v2 = vadd.f32 %v3295_v59, %v2464_v52 }
0x11e8   :  { %v3300_v53 = vmul.f32 -1.442695, %v2474_v50 }
0x11e9   :  { %v3299_v57 = vmul.f32 -1.442695, %v2473_v2  ;;  %v3606_v61 = vpop.f32.mrb[10].mxu0 }
0x11ea   :  { %v2311_v62 = vadd.f32 %v4610_v51, %v3606_v61  ;;  %v2301_v0 = vpop.f32.mrb[11].mxu0  ;;  %3962 = vpow2.f32 %v3300_v53 }
0x11eb   :  { %v2310_v30 = vadd.f32 %v4610_v51, %v2301_v0  ;;  %3964 = vpow2.f32 %v3299_v57 }
0x11ec   :  { %v3294_v32 = vmul.f32 -1.442695, %v2311_v62 }
0x11ed   :  { %v3293_v40 = vmul.f32 -1.442695, %v2310_v30 }
0x11ee   :  { %3966 = vpow2.f32 %v3294_v32 }
0x11ef   :  { %3968 = vpow2.f32 %v3293_v40 }
0x11f0   :  { %3970 = vtanh.f32 %v2311_v62 }
0x11f1   :  { %3972 = vtanh.f32 %v2310_v30 }
0x11f4   :  { %v3963_v36 = vpop.eup %3962 }
0x11f5   :  { %v3965_v3 = vpop.eup %3964  ;;  %v2482_v5 = vadd.f32 1.0, %v3963_v36 }
0x11f6   :  { %v2481_v10 = vadd.f32 1.0, %v3965_v3 }
0x11f8   :  { %v3967_v38 = vpop.eup %3966 }
0x11f9   :  { %v3969_v6 = vpop.eup %3968  ;;  %v2319_v9 = vadd.f32 1.0, %v3967_v38 }
0x11fa   :  { %v2318_v12 = vadd.f32 1.0, %v3969_v6  ;;  %v3971_v14 = vpop.eup %3970 }
0x11fb   :  { %3974 = vrcp.f32 %v2319_v9  ;;  %v3973_v15 = vpop.eup %3972 }
0x11fc   :  { %3976 = vrcp.f32 %v2318_v12 }
0x11fd   :  { %3978 = vrcp.f32 %v2482_v5 }
0x11fe   :  { %3980 = vrcp.f32 %v2481_v10 }
0x11ff   :  { %3982 = vtanh.f32 %v2474_v50 }
0x1200   :  { %3984 = vtanh.f32 %v2473_v2 }
0x1205   :  { %v3975_v16 = vpop.eup %3974 }
0x1206   :  { %v3977_v19 = vpop.eup %3976  ;;  %v2327_v20 = vsel %vm4137_vm3, %v3971_v14, %v3975_v16  ;;  %v3308_v14 = vld [vmem:[%s4984_s0 + $0x78] sm:$0xff] }
0x1207   :  { %v3979_v63 = vpop.eup %3978  ;;  %2334 = vrot.lane.b32.xlu1 %v2327_v20, %s4047_s16  ;;  %v2326_v23 = vsel %vm4137_vm3, %v3973_v15, %v3977_v19  ;;  %v2329_v41 = vmul.f32 %v2327_v20, %v4550_v54  ;;  %v3307_v15 = vld [vmem:[%s4984_s0 + $0x70] sm:$0xff]  ;;  %s4056_s0 = smov 109  }
0x1208   :  { %v3981_v55 = vpop.eup %3980  ;;  %2332 = vrot.lane.b32.xlu0 %v2326_v23, %s4047_s16  ;;  %v2328_v47 = vmul.f32 %v2326_v23, %v4552_v60 }
0x1209   :  { %v3983_v58 = vpop.eup %3982 }
0x120a   :  { %v3985_v27 = vpop.eup %3984  ;;  %v2490_v45 = vsel %vm4137_vm3, %v3983_v58, %v3979_v63 }
0x120b   :  { %2497 = vrot.lane.b32.xlu1 %v2490_v45, %s4047_s16  ;;  %v2489_v28 = vsel %vm4137_vm3, %v3985_v27, %v3981_v55  ;;  %v2492_v52 = vmul.f32 %v2490_v45, %v4558_v25 }
0x120c   :  { %2495 = vrot.lane.b32.xlu0 %v2489_v28, %s4047_s16  ;;  %v2491_v53 = vmul.f32 %v2489_v28, %v4560_v26 }
0x1279   :  { %v2335_v1 = vpop.permute.xlu1 %2334 }
0x127a   :  { %v2339_v31 = vmul.f32 %v2335_v1, %v2327_v20  ;;  %v2333_v34 = vpop.permute.xlu0 %2332 }
0x127b   :  { %v2338_v35 = vmul.f32 %v2333_v34, %v2326_v23 }
0x127c   :  { %2344 = vrot.lane.b32.xlu1 %v2339_v31, %s4046_s7 }
0x127d   :  { %v2498_v11 = vpop.permute.xlu1 %2497  ;;  %2342 = vrot.lane.b32.xlu0 %v2338_v35, %s4046_s7 }
0x127e   :  { %v2502_v13 = vmul.f32 %v2498_v11, %v2490_v45  ;;  %v2496_v39 = vpop.permute.xlu0 %2495 }
0x127f   :  { %v2501_v17 = vmul.f32 %v2496_v39, %v2489_v28 }
0x1280   :  { %2507 = vrot.lane.b32.xlu1 %v2502_v13, %s4046_s7 }
0x1281   :  { %2505 = vrot.lane.b32.xlu0 %v2501_v17, %s4046_s7 }
0x12ee   :  { %v2345_v44 = vpop.permute.xlu1 %2344 }
0x12ef   :  { %v4632_v59 = vadd.f32 %v2345_v44, %v2329_v41  ;;  %v2343_v49 = vpop.permute.xlu0 %2342 }
0x12f0   :  { %v4634_v50 = vadd.f32 %v2343_v49, %v2328_v47 }
0x12f1   :  { %3986 = vtanh.f32 %v4632_v59 }
0x12f2   :  { %3988 = vtanh.f32 %v4634_v50  ;;  %v2508_v2 = vpop.permute.xlu1 %2507 }
0x12f3   :  { %v4640_v57 = vadd.f32 %v2508_v2, %v2492_v52  ;;  %v2506_v54 = vpop.permute.xlu0 %2505 }
0x12f4   :  { %v4642_v61 = vadd.f32 %v2506_v54, %v2491_v53 }
0x12f5   :  { %3990 = vtanh.f32 %v4640_v57 }
0x12f6   :  { %3992 = vtanh.f32 %v4642_v61 }
0x12fb   :  { %v3987_v60 = vpop.eup %3986 }
0x12fc   :  { %v3989_v62 = vpop.eup %3988  ;;  %2356 = vrot.lane.b32.xlu1 %v3987_v60, %s4048_s8 }
0x12fd   :  { %2354 = vrot.lane.b32.xlu0 %v3989_v62, %s4048_s8 }
0x12ff   :  { %v3991_v25 = vpop.eup %3990 }
0x1300   :  { %v3993_v0 = vpop.eup %3992  ;;  %2519 = vrot.lane.b32.xlu1 %v3991_v25, %s4048_s8 }
0x1301   :  { %2517 = vrot.lane.b32.xlu0 %v3993_v0, %s4048_s8 }
0x136e   :  { %v2357_v26 = vpop.permute.xlu1 %2356 }
0x136f   :  { %v4650_v30 = vmul.f32 %v2357_v26, %v2327_v20  ;;  %v2355_v32 = vpop.permute.xlu0 %2354 }
0x1370   :  { %v4652_v40 = vmul.f32 %v2355_v32, %v2326_v23 }
0x1371   :  { %2529 = vrot.lane.b32.xlu1 %v4650_v30, %s4049_s11 }
0x1372   :  { %v2520_v36 = vpop.permute.xlu1 %2519  ;;  %2527 = vrot.lane.b32.xlu0 %v4652_v40, %s4049_s11 }
0x1373   :  { %v2524_v3 = vmul.f32 %v2520_v36, %v2490_v45  ;;  %v2518_v38 = vpop.permute.xlu0 %2517 }
0x1374   :  { %v2523_v6 = vmul.f32 %v2518_v38, %v2489_v28 }
0x1375   :  { %2614 = vrot.lane.b32.xlu1 %v2524_v3, %s4049_s11 }
0x1376   :  { %2612 = vrot.lane.b32.xlu0 %v2523_v6, %s4049_s11 }
0x13e3   :  { %v2530_v5 = vpop.permute.xlu1 %2529 }
0x13e4   :  { %v2528_v9 = vpop.permute.xlu0 %2527 }
0x13e5   :  { %3622 = vmatprep.mubr.msk.f32.mxu1 %vm54_vm0, %v2528_v9 }
0x13e6   :  { %3623 = vmatmul.mubr.msk.f32.vlgmr.msra.gmra.mrb[14].mxu1 %vm54_vm0, %v2530_v5 }
0x13e7   :  { %3744 = vmatpush3.bf16.msra.mxu1 %v4182_v48  ;;  %v2615_v12 = vpop.permute.xlu1 %2614 }
0x13e8   :  { %v2613_v10 = vpop.permute.xlu0 %2612  ;;  %3629 = vmatprep.subr.mxu1 %v4584_v18 }
0x13e9   :  { %3631 = vmatprep.mubr.msk.f32.mxu1 %vm54_vm0, %v2613_v10  ;;  %3640 = vmatprep.mubr.msk.f32.mxu0 %vm54_vm0, %v2613_v10 }
0x13ea   :  { %3641 = vmatmul.mubr.msk.f32.vlgmr.msra.gmra.mrb[12].mxu0 %vm54_vm0, %v2615_v12 }
0x13eb   :  { %3630 = vmatpush3.msra.mxu1 %v4584_v18  ;;  %3752 = vmatpush3.bf16.msra.mxu0 %v4161_v43 }
0x13ec   :  { %3647 = vmatprep.subr.mxu0 %v4508_v56 }
0x13ee   :  { %3632 = vmatmul.mubr.msk.f32.vlgmr.msra.gmra.mrb[14].mxu1 %vm54_vm0, %v2615_v12 }
0x13ef   :  { %3648 = vmatpush3.msra.mxu0 %v4508_v56 }
0x13f0   :  { %3754 = vmatprep.subr.bf16.mxu0 %v4182_v48 }
0x14bd   :  { %v3642_v16 = vpop.f32.mrb[12].mxu0 }
0x14be   :  { %v2859_v19 = vadd.f32 %v3642_v16, %v3308_v14  ;;  %v2849_v20 = vpop.f32.mrb[13].mxu0 }
0x14bf   :  { %v2858_v43 = vadd.f32 %v3307_v15, %v2849_v20 }
0x14c0   :  { %v3312_v63 = vmul.f32 -1.442695, %v2859_v19 }
0x14c1   :  { %v3311_v23 = vmul.f32 -1.442695, %v2858_v43  ;;  %v3633_v55 = vpop.f32.mrb[14].mxu1 }
0x14c2   :  { %v2696_v58 = vadd.f32 %v4610_v51, %v3633_v55  ;;  %v2686_v56 = vpop.f32.mrb[15].mxu1  ;;  %3994 = vpow2.f32 %v3312_v63 }
0x14c3   :  { %v2695_v27 = vadd.f32 %v4610_v51, %v2686_v56  ;;  %3996 = vpow2.f32 %v3311_v23 }
0x14c4   :  { %v3306_v45 = vmul.f32 -1.442695, %v2696_v58 }
0x14c5   :  { %v3305_v28 = vmul.f32 -1.442695, %v2695_v27 }
0x14c6   :  { %3998 = vpow2.f32 %v3306_v45 }
0x14c7   :  { %4000 = vpow2.f32 %v3305_v28 }
0x14c8   :  { %4002 = vtanh.f32 %v2696_v58 }
0x14c9   :  { %4004 = vtanh.f32 %v2695_v27 }
0x14cc   :  { %v3995_v1 = vpop.eup %3994 }
0x14cd   :  { %v3997_v31 = vpop.eup %3996  ;;  %v2867_v11 = vadd.f32 1.0, %v3995_v1 }
0x14ce   :  { %v2866_v39 = vadd.f32 1.0, %v3997_v31 }
0x14d0   :  { %v3999_v34 = vpop.eup %3998 }
0x14d1   :  { %v4001_v35 = vpop.eup %4000  ;;  %v2704_v13 = vadd.f32 1.0, %v3999_v34 }
0x14d2   :  { %v2703_v17 = vadd.f32 1.0, %v4001_v35  ;;  %v4003_v41 = vpop.eup %4002 }
0x14d3   :  { %4006 = vrcp.f32 %v2704_v13  ;;  %v4005_v44 = vpop.eup %4004 }
0x14d4   :  { %4008 = vrcp.f32 %v2703_v17 }
0x14d5   :  { %4010 = vrcp.f32 %v2867_v11 }
0x14d6   :  { %4012 = vrcp.f32 %v2866_v39 }
0x14d7   :  { %4014 = vtanh.f32 %v2859_v19 }
0x14d8   :  { %4016 = vtanh.f32 %v2858_v43 }
0x14dd   :  { %v4007_v47 = vpop.eup %4006 }
0x14de   :  { %v4009_v49 = vpop.eup %4008  ;;  %v2712_v52 = vsel %vm4137_vm3, %v4003_v41, %v4007_v47 }
0x14df   :  { %v4011_v2 = vpop.eup %4010  ;;  %2719 = vrot.lane.b32.xlu1 %v2712_v52, %s4047_s16  ;;  %v2711_v53 = vsel %vm4137_vm3, %v4005_v44, %v4009_v49  ;;  %v2714_v10 = vmul.f32 %v2712_v52, %v4632_v59 }
0x14e0   :  { %v4013_v54 = vpop.eup %4012  ;;  %2717 = vrot.lane.b32.xlu0 %v2711_v53, %s4047_s16  ;;  %v2713_v14 = vmul.f32 %v2711_v53, %v4634_v50 }
0x14e1   :  { %v4015_v60 = vpop.eup %4014 }
0x14e2   :  { %v4017_v62 = vpop.eup %4016  ;;  %v2875_v25 = vsel %vm4137_vm3, %v4015_v60, %v4011_v2 }
0x14e3   :  { %2882 = vrot.lane.b32.xlu1 %v2875_v25, %s4047_s16  ;;  %v2874_v0 = vsel %vm4137_vm3, %v4017_v62, %v4013_v54  ;;  %v2877_v20 = vmul.f32 %v2875_v25, %v4640_v57 }
0x14e4   :  { %2880 = vrot.lane.b32.xlu0 %v2874_v0, %s4047_s16  ;;  %v2876_v63 = vmul.f32 %v2874_v0, %v4642_v61 }
0x1551   :  { %v2720_v26 = vpop.permute.xlu1 %2719 }
0x1552   :  { %v2724_v32 = vmul.f32 %v2720_v26, %v2712_v52  ;;  %v2718_v36 = vpop.permute.xlu0 %2717 }
0x1553   :  { %v2723_v3 = vmul.f32 %v2718_v36, %v2711_v53 }
0x1554   :  { %2729 = vrot.lane.b32.xlu1 %v2724_v32, %s4046_s7  ;;  %v4759_v32 = vld [vmem:[%s4985_s4 + $0x1] ss:$0 sm:$0xff]  ;;  %s4051_s4 = smov 104  }
0x1555   :  { %v2883_v38 = vpop.permute.xlu1 %2882  ;;  %2727 = vrot.lane.b32.xlu0 %v2723_v3, %s4046_s7 }
0x1556   :  { %v2887_v6 = vmul.f32 %v2883_v38, %v2875_v25  ;;  %v2881_v5 = vpop.permute.xlu0 %2880 }
0x1557   :  { %v2886_v9 = vmul.f32 %v2881_v5, %v2874_v0 }
0x1558   :  { %2892 = vrot.lane.b32.xlu1 %v2887_v6, %s4046_s7 }
0x1559   :  { %2890 = vrot.lane.b32.xlu0 %v2886_v9, %s4046_s7 }
0x15c6   :  { %v2730_v12 = vpop.permute.xlu1 %2729 }
0x15c7   :  { %v4699_v15 = vadd.f32 %v2730_v12, %v2714_v10  ;;  %v2728_v16 = vpop.permute.xlu0 %2727 }
0x15c8   :  { %v4701_v19 = vadd.f32 %v2728_v16, %v2713_v14 }
0x15c9   :  { %4018 = vtanh.f32 %v4699_v15 }
0x15ca   :  { %4020 = vtanh.f32 %v4701_v19  ;;  %v2893_v43 = vpop.permute.xlu1 %2892 }
0x15cb   :  { %v4707_v23 = vadd.f32 %v2893_v43, %v2877_v20  ;;  %v2891_v59 = vpop.permute.xlu0 %2890 }
0x15cc   :  { %v4709_v55 = vadd.f32 %v2891_v59, %v2876_v63 }
0x15cd   :  { %4022 = vtanh.f32 %v4707_v23 }
0x15ce   :  { %4024 = vtanh.f32 %v4709_v55 }
0x15d3   :  { %v4019_v50 = vpop.eup %4018 }
0x15d4   :  { %v4021_v58 = vpop.eup %4020  ;;  %2741 = vrot.lane.b32.xlu1 %v4019_v50, %s4048_s8 }
0x15d5   :  { %2739 = vrot.lane.b32.xlu0 %v4021_v58, %s4048_s8 }
0x15d7   :  { %v4023_v57 = vpop.eup %4022 }
0x15d8   :  { %v4025_v56 = vpop.eup %4024  ;;  %2904 = vrot.lane.b32.xlu1 %v4023_v57, %s4048_s8 }
0x15d9   :  { %2902 = vrot.lane.b32.xlu0 %v4025_v56, %s4048_s8 }
0x1646   :  { %v2742_v61 = vpop.permute.xlu1 %2741 }
0x1647   :  { %v4717_v27 = vmul.f32 %v2742_v61, %v2712_v52  ;;  %v2740_v45 = vpop.permute.xlu0 %2739 }
0x1648   :  { %v4719_v28 = vmul.f32 %v2740_v45, %v2711_v53 }
0x1649   :  { %2914 = vrot.lane.b32.xlu1 %v4717_v27, %s4049_s11 }
0x164a   :  { %v2905_v1 = vpop.permute.xlu1 %2904  ;;  %2912 = vrot.lane.b32.xlu0 %v4719_v28, %s4049_s11 }
0x164b   :  { %v2909_v31 = vmul.f32 %v2905_v1, %v2875_v25  ;;  %v2903_v34 = vpop.permute.xlu0 %2902  ;;  %v4801_v1 = vld [vmem:[%s4987_s1] sm:$0xff] }
0x164c   :  { %v2908_v35 = vmul.f32 %v2903_v34, %v2874_v0 }
0x164d   :  { %2999 = vrot.lane.b32.xlu1 %v2909_v31, %s4049_s11 }
0x164e   :  { %2997 = vrot.lane.b32.xlu0 %v2908_v35, %s4049_s11 }
0x16bb   :  { %v2915_v11 = vpop.permute.xlu1 %2914 }
0x16bc   :  { %v2913_v13 = vpop.permute.xlu0 %2912 }
0x16bd   :  { %3649 = vmatprep.mubr.msk.f32.mxu0 %vm54_vm0, %v2913_v13 }
0x16be   :  { %3650 = vmatmul.mubr.msk.f32.vlgmr.msra.gmra.mrb[14].mxu0 %vm54_vm0, %v2915_v11 }
0x16bf   :  { %3756 = vmatpush3.bf16.msra.mxu0 %v4182_v48  ;;  %v3000_v39 = vpop.permute.xlu1 %2999 }
0x16c0   :  { %3168 = vst.msk [vmem:[%s4986_s6 + $0x8] sm:$0xff] %vm54_vm0, %v3000_v39  ;;  %v2998_v17 = vpop.permute.xlu0 %2997  ;;  %3656 = vmatprep.subr.mxu0 %v4584_v18 }
0x16c1   :  { %3167 = vst.msk [vmem:[%s4986_s6] sm:$0xff] %vm54_vm0, %v2998_v17  ;;  %3658 = vmatprep.mubr.msk.f32.mxu0 %vm54_vm0, %v2998_v17 }
0x16c3   :  { %3657 = vmatpush3.msra.mxu0 %v4584_v18 }
0x16c6   :  { %3659 = vmatmul.mubr.msk.f32.vlgmr.msra.gmra.mrb[14].mxu0 %vm54_vm0, %v3000_v39 }
0x1799   :  { %v3660_v48 = vpop.f32.mrb[14].mxu0 }
0x179a   :  { %v3081_v41 = vadd.f32 %v4610_v51, %v3660_v48  ;;  %v3071_v44 = vpop.f32.mrb[15].mxu0 }
0x179b   :  { %v3080_v47 = vadd.f32 %v4610_v51, %v3071_v44 }
0x179c   :  { %v3318_v49 = vmul.f32 -1.442695, %v3081_v41 }
0x179d   :  { %v3317_v52 = vmul.f32 -1.442695, %v3080_v47 }
0x179e   :  { %4026 = vpow2.f32 %v3318_v49 }
0x179f   :  { %4028 = vpow2.f32 %v3317_v52 }
0x17a0   :  { %4030 = vtanh.f32 %v3081_v41 }
0x17a1   :  { %4032 = vtanh.f32 %v3080_v47 }
0x17a8   :  { %v4027_v2 = vpop.eup %4026 }
0x17a9   :  { %v4029_v53 = vpop.eup %4028  ;;  %v3089_v54 = vadd.f32 1.0, %v4027_v2 }
0x17aa   :  { %v3088_v60 = vadd.f32 1.0, %v4029_v53  ;;  %v4031_v18 = vpop.eup %4030 }
0x17ab   :  { %4034 = vrcp.f32 %v3089_v54  ;;  %v4033_v62 = vpop.eup %4032 }
0x17ac   :  { %4036 = vrcp.f32 %v3088_v60 }
0x17b5   :  { %v4035_v25 = vpop.eup %4034 }
0x17b6   :  { %v4037_v0 = vpop.eup %4036  ;;  %v4746_v26 = vsel %vm4137_vm3, %v4031_v18, %v4035_v25 }
0x17b7   :  { %3104 = vrot.lane.b32.xlu1 %v4746_v26, %s4047_s16  ;;  %v4752_v51 = vsel %vm4137_vm3, %v4033_v62, %v4037_v0  ;;  %v3099_v16 = vmul.f32 %v4746_v26, %v4699_v15 }
0x17b8   :  { %3102 = vrot.lane.b32.xlu0 %v4752_v51, %s4047_s16  ;;  %v3098_v63 = vmul.f32 %v4752_v51, %v4701_v19 }
0x17bc   :  { %433 = vrot.lane.b32.xlu0 %v4759_v32, %s4050_s17 }
0x1829   :  { %v3105_v6 = vpop.permute.xlu1 %3104 }
0x182a   :  { %v3103_v36 = vpop.permute.xlu0 %3102  ;;  %v3109_v5 = vmul.f32 %v3105_v6, %v4746_v26 }
0x182b   :  { %v3108_v9 = vmul.f32 %v3103_v36, %v4752_v51 }
0x182e   :  { %v4762_v3 = vpop.permute.xlu0 %433 }
0x182f   :  { %v437_v38 = vmul.f32 %v4762_v3, %v4270_v4  ;;  %v436_v22 = vmul.f32 %v4762_v3, %v4272_v7  ;;  %v823_v15 = vmul.f32 %v4342_v21, %v4762_v3  ;;  %v822_v19 = vmul.f32 %v4344_v24, %v4762_v3  ;;  %v4806_v21 = vld [vmem:[%s4987_s1 + $0x8] sm:$0xff]  ;;  %s4052_s1 = smov 105  }
0x1830   :  { %v1207_v2 = vmul.f32 %v4416_v46, %v4762_v3  ;;  %v1593_v53 = vmul.f32 %v4486_v37, %v4762_v3  ;;  %v1208_v54 = vmul.f32 %v4414_v42, %v4762_v3  ;;  %v1978_v60 = vmul.f32 %v4568_v29, %v4762_v3 }
0x1831   :  { %442 = vrot.lane.b32.xlu0 %v437_v38, %s4049_s11  ;;  %440 = vrot.lane.b32.xlu1 %v436_v22, %s4049_s11  ;;  %v1592_v46 = vmul.f32 %v4488_v8, %v4762_v3  ;;  %v2363_v37 = vmul.f32 %v4650_v30, %v4762_v3  ;;  %v1977_v42 = vmul.f32 %v4570_v33, %v4762_v3 }
0x1832   :  { %v2748_v29 = vmul.f32 %v4717_v27, %v4762_v3  ;;  %v2362_v30 = vmul.f32 %v4652_v40, %v4762_v3  ;;  %v2747_v33 = vmul.f32 %v4719_v28, %v4762_v3 }
0x1835   :  { %3112 = vrot.lane.b32.xlu0 %v3108_v9, %s4046_s7  ;;  %3114 = vrot.lane.b32.xlu1 %v3109_v5, %s4046_s7 }
0x18a3   :  { %v443_v10 = vpop.permute.xlu0 %442  ;;  %v441_v12 = vpop.permute.xlu1 %440 }
0x18a4   :  { %v449_v4 = vsel %vm54_vm0, %v443_v10, 0.0  ;;  %v446_v14 = vsel %vm54_vm0, %v441_v12, 0.0 }
0x18a5   :  { %450 = vadd.xlane.f32.xlu0 %v449_v4  ;;  %447 = vadd.xlane.f32.xlu1 %v446_v14 }
0x18a7   :  { %v3115_v7 = vpop.permute.xlu1 %3114  ;;  %v3113_v20 = vpop.permute.xlu0 %3112 }
0x18a8   :  { %v4778_v43 = vadd.f32 %v3115_v7, %v3099_v16  ;;  %v4782_v59 = vadd.f32 %v3113_v20, %v3098_v63 }
0x18aa   :  { %4038 = vtanh.f32 %v4778_v43 }
0x18ab   :  { %4040 = vtanh.f32 %v4782_v59 }
0x18b4   :  { %v4039_v61 = vpop.eup %4038 }
0x18b5   :  { %v4041_v45 = vpop.eup %4040 }
0x1932   :  { %v451_v50 = vpop.xlane.xlu0 %450  ;;  %v448_v58 = vpop.xlane.xlu1 %447 }
0x1933   :  { %v454_v57 = vadd.f32 %v4759_v32, %v451_v50  ;;  %v453_v56 = vadd.f32 %v4759_v32, %v448_v58 }
0x1935   :  { %461 = vrot.lane.b32.xlu1 %v454_v57, %s4051_s4  ;;  %459 = vrot.lane.b32.xlu0 %v453_v56, %s4051_s4 }
0x1939   :  { %828 = vrot.lane.b32.xlu0 %v823_v15, %s4049_s11  ;;  %826 = vrot.lane.b32.xlu1 %v822_v19, %s4049_s11 }
0x193d   :  { %3126 = vrot.lane.b32.xlu0 %v4039_v61, %s4048_s8 }
0x1941   :  { %3124 = vrot.lane.b32.xlu0 %v4041_v45, %s4048_s8 }
0x19a7   :  { %v460_v24 = vpop.permute.xlu0 %459  ;;  %v462_v31 = vpop.permute.xlu1 %461 }
0x19a8   :  { %v465_v34 = vmul.f32 %v460_v24, %v4801_v1  ;;  %v466_v35 = vmul.f32 %v462_v31, %v4806_v21 }
0x19aa   :  { %468 = vst.msk [vmem:[%s4988_s5] sm:$0xff] %vm467_vm4, %v465_v34  ;;  %469 = vst.msk [vmem:[%s4988_s5 + $0x8] sm:$0xff] %vm467_vm4, %v466_v35 }
0x19ab   :  { %v829_v11 = vpop.permute.xlu0 %828  ;;  %v827_v13 = vpop.permute.xlu1 %826 }
0x19ac   :  { %v835_v39 = vsel %vm54_vm0, %v829_v11, 0.0  ;;  %v832_v17 = vsel %vm54_vm0, %v827_v13, 0.0 }
0x19ad   :  { %833 = vadd.xlane.f32.xlu1 %v832_v17  ;;  %836 = vadd.xlane.f32.xlu0 %v835_v39 }
0x19af   :  { %v3127_v48 = vpop.permute.xlu0 %3126 }
0x19b0   :  { %v4839_v18 = vmul.f32 %v3127_v48, %v4746_v26 }
0x19b2   :  { %v3133_v8 = vmul.f32 %v4839_v18, %v4762_v3 }
0x19b3   :  { %v3125_v41 = vpop.permute.xlu0 %3124 }
0x19b4   :  { %v4854_v62 = vmul.f32 %v3125_v41, %v4752_v51 }
0x19b6   :  { %v3132_v27 = vmul.f32 %v4854_v62, %v4762_v3 }
0x1a3a   :  { %v834_v44 = vpop.xlane.xlu1 %833  ;;  %v837_v47 = vpop.xlane.xlu0 %836 }
0x1a3b   :  { %v838_v49 = vadd.f32 %v4759_v32, %v834_v44  ;;  %v839_v52 = vadd.f32 %v4759_v32, %v837_v47 }
0x1a3d   :  { %844 = vrot.lane.b32.xlu1 %v838_v49, %s4052_s1  ;;  %846 = vrot.lane.b32.xlu0 %v839_v52, %s4052_s1 }
0x1a41   :  { %1211 = vrot.lane.b32.xlu1 %v1207_v2, %s4049_s11  ;;  %1598 = vrot.lane.b32.xlu0 %v1593_v53, %s4049_s11 }
0x1a45   :  { %1213 = vrot.lane.b32.xlu1 %v1208_v54, %s4049_s11  ;;  %1983 = vrot.lane.b32.xlu0 %v1978_v60, %s4049_s11 }
0x1a49   :  { %1596 = vrot.lane.b32.xlu1 %v1592_v46, %s4049_s11  ;;  %2368 = vrot.lane.b32.xlu0 %v2363_v37, %s4049_s11 }
0x1a4d   :  { %1981 = vrot.lane.b32.xlu1 %v1977_v42, %s4049_s11  ;;  %2753 = vrot.lane.b32.xlu0 %v2748_v29, %s4049_s11 }
0x1a51   :  { %2366 = vrot.lane.b32.xlu1 %v2362_v30, %s4049_s11  ;;  %3138 = vrot.lane.b32.xlu0 %v3133_v8, %s4049_s11 }
0x1a55   :  { %2751 = vrot.lane.b32.xlu1 %v2747_v33, %s4049_s11 }
0x1a59   :  { %3136 = vrot.lane.b32.xlu1 %v3132_v27, %s4049_s11 }
0x1aaf   :  { %v845_v25 = vpop.permute.xlu1 %844  ;;  %v847_v40 = vpop.permute.xlu0 %846 }
0x1ab0   :  { %v850_v0 = vmul.f32 %v845_v25, %v4801_v1  ;;  %v851_v26 = vmul.f32 %v847_v40, %v4806_v21 }
0x1ab2   :  { %853 = vst.msk [vmem:[%s4988_s5] sm:$0xff] %vm852_vm5, %v850_v0  ;;  %854 = vst.msk [vmem:[%s4988_s5 + $0x8] sm:$0xff] %vm852_vm5, %v851_v26 }
0x1ab3   :  { %v1212_v28 = vpop.permute.xlu1 %1211  ;;  %v1599_v22 = vpop.permute.xlu0 %1598 }
0x1ab4   :  { %v1217_v51 = vsel %vm54_vm0, %v1212_v28, 0.0  ;;  %v1605_v58 = vsel %vm54_vm0, %v1599_v22, 0.0 }
0x1ab5   :  { %1218 = vadd.xlane.f32.xlu1 %v1217_v51 }
0x1ab7   :  { %v1214_v36 = vpop.permute.xlu1 %1213  ;;  %v1984_v5 = vpop.permute.xlu0 %1983 }
0x1ab8   :  { %v1220_v3 = vsel %vm54_vm0, %v1214_v36, 0.0  ;;  %v1990_v61 = vsel %vm54_vm0, %v1984_v5, 0.0 }
0x1ab9   :  { %1221 = vadd.xlane.f32.xlu0 %v1220_v3 }
0x1abb   :  { %v1597_v38 = vpop.permute.xlu1 %1596  ;;  %v2369_v10 = vpop.permute.xlu0 %2368 }
0x1abc   :  { %v1602_v15 = vsel %vm54_vm0, %v1597_v38, 0.0  ;;  %v2375_v24 = vsel %vm54_vm0, %v2369_v10, 0.0 }
0x1abf   :  { %v1982_v6 = vpop.permute.xlu1 %1981  ;;  %v2754_v4 = vpop.permute.xlu0 %2753 }
0x1ac0   :  { %v1987_v57 = vsel %vm54_vm0, %v1982_v6, 0.0  ;;  %v2760_v31 = vsel %vm54_vm0, %v2754_v4, 0.0 }
0x1ac3   :  { %v2367_v9 = vpop.permute.xlu1 %2366  ;;  %v3139_v7 = vpop.permute.xlu0 %3138 }
0x1ac4   :  { %v2372_v56 = vsel %vm54_vm0, %v2367_v9, 0.0  ;;  %v3145_v34 = vsel %vm54_vm0, %v3139_v7, 0.0 }
0x1ac7   :  { %v2752_v12 = vpop.permute.xlu1 %2751 }
0x1ac8   :  { %v2757_v19 = vsel %vm54_vm0, %v2752_v12, 0.0 }
0x1acb   :  { %v3137_v14 = vpop.permute.xlu1 %3136 }
0x1acc   :  { %v3142_v45 = vsel %vm54_vm0, %v3137_v14, 0.0 }
0x1b42   :  { %v1219_v16 = vpop.xlane.xlu1 %1218 }
0x1b43   :  { %v1223_v20 = vadd.f32 %v4759_v32, %v1219_v16 }
0x1b45   :  { %1229 = vrot.lane.b32.xlu0 %v1223_v20, %s4053_s25 }
0x1b46   :  { %v1222_v63 = vpop.xlane.xlu0 %1221 }
0x1b47   :  { %v1224_v50 = vadd.f32 %v4759_v32, %v1222_v63 }
0x1b49   :  { %1231 = vrot.lane.b32.xlu1 %v1224_v50, %s4053_s25 }
0x1b64   :  { %1606 = vadd.xlane.f32.xlu0 %v1605_v58 }
0x1b68   :  { %1988 = vadd.xlane.f32.xlu0 %v1987_v57 }
0x1b6c   :  { %2373 = vadd.xlane.f32.xlu0 %v2372_v56 }
0x1b6d   :  { %1603 = vadd.xlane.f32.xlu1 %v1602_v15 }
0x1b70   :  { %2758 = vadd.xlane.f32.xlu0 %v2757_v19 }
0x1b71   :  { %1991 = vadd.xlane.f32.xlu1 %v1990_v61 }
0x1b74   :  { %3143 = vadd.xlane.f32.xlu0 %v3142_v45 }
0x1b75   :  { %2376 = vadd.xlane.f32.xlu1 %v2375_v24 }
0x1b79   :  { %2761 = vadd.xlane.f32.xlu1 %v2760_v31 }
0x1b7d   :  { %3146 = vadd.xlane.f32.xlu1 %v3145_v34 }
0x1bb7   :  { %v1230_v35 = vpop.permute.xlu0 %1229 }
0x1bb8   :  { %v1235_v11 = vmul.f32 %v1230_v35, %v4801_v1 }
0x1bba   :  { %1238 = vst.msk [vmem:[%s4988_s5] sm:$0xff] %vm1237_vm6, %v1235_v11 }
0x1bbb   :  { %v1232_v13 = vpop.permute.xlu1 %1231 }
0x1bbc   :  { %v1236_v39 = vmul.f32 %v1232_v13, %v4806_v21 }
0x1bbe   :  { %1239 = vst.msk [vmem:[%s4988_s5 + $0x8] sm:$0xff] %vm1237_vm6, %v1236_v39 }
0x1bf1   :  { %v1607_v17 = vpop.xlane.xlu0 %1606 }
0x1bf2   :  { %v1609_v48 = vadd.f32 %v4759_v32, %v1607_v17 }
0x1bf4   :  { %1616 = vrot.lane.b32.xlu1 %v1609_v48, %s4054_s30 }
0x1bf5   :  { %v1989_v41 = vpop.xlane.xlu0 %1988 }
0x1bf6   :  { %v1993_v44 = vadd.f32 %v4759_v32, %v1989_v41 }
0x1bf8   :  { %1999 = vrot.lane.b32.xlu1 %v1993_v44, %s4055_s9 }
0x1bf9   :  { %v2374_v47 = vpop.xlane.xlu0 %2373 }
0x1bfa   :  { %v2378_v49 = vadd.f32 %v4759_v32, %v2374_v47  ;;  %v1604_v52 = vpop.xlane.xlu1 %1603 }
0x1bfb   :  { %v1608_v2 = vadd.f32 %v4759_v32, %v1604_v52 }
0x1bfc   :  { %2384 = vrot.lane.b32.xlu1 %v2378_v49, %s4056_s0 }
0x1bfd   :  { %1614 = vrot.lane.b32.xlu0 %v1608_v2, %s4054_s30  ;;  %v2759_v53 = vpop.xlane.xlu0 %2758 }
0x1bfe   :  { %v2763_v54 = vadd.f32 %v4759_v32, %v2759_v53  ;;  %v1992_v60 = vpop.xlane.xlu1 %1991 }
0x1bff   :  { %v1994_v46 = vadd.f32 %v4759_v32, %v1992_v60 }
0x1c00   :  { %2769 = vrot.lane.b32.xlu1 %v2763_v54, %s4057_s10 }
0x1c01   :  { %2001 = vrot.lane.b32.xlu0 %v1994_v46, %s4055_s9  ;;  %v3144_v8 = vpop.xlane.xlu0 %3143 }
0x1c02   :  { %v2377_v37 = vpop.xlane.xlu1 %2376  ;;  %v3148_v33 = vadd.f32 %v4759_v32, %v3144_v8 }
0x1c03   :  { %v2379_v42 = vadd.f32 %v4759_v32, %v2377_v37 }
0x1c04   :  { %3171 = vrot.lane.b32.xlu1 %v4854_v62, %s4049_s11 }
0x1c05   :  { %2386 = vrot.lane.b32.xlu0 %v2379_v42, %s4056_s0 }
0x1c06   :  { %v2762_v29 = vpop.xlane.xlu1 %2761 }
0x1c07   :  { %v2764_v30 = vadd.f32 %v4759_v32, %v2762_v29 }
0x1c08   :  { %3182 = vrot.lane.b32.xlu1 %v4709_v55, %s4051_s4 }
0x1c09   :  { %2771 = vrot.lane.b32.xlu0 %v2764_v30, %s4057_s10 }
0x1c0a   :  { %v3147_v27 = vpop.xlane.xlu1 %3146 }
0x1c0b   :  { %v3149_v62 = vadd.f32 %v4759_v32, %v3147_v27 }
0x1c0c   :  { %3154 = vrot.lane.b32.xlu1 %v3148_v33, %s4058_s12 }
0x1c0d   :  { %3173 = vrot.lane.b32.xlu0 %v4839_v18, %s4049_s11 }
0x1c10   :  { %3193 = vrot.lane.b32.xlu1 %v4782_v59, %s4051_s4 }
0x1c11   :  { %3184 = vrot.lane.b32.xlu0 %v4707_v23, %s4051_s4 }
0x1c15   :  { %3156 = vrot.lane.b32.xlu0 %v3149_v62, %s4058_s12 }
0x1c19   :  { %3195 = vrot.lane.b32.xlu0 %v4778_v43, %s4051_s4 }
0x1c66   :  { %v1617_v55 = vpop.permute.xlu1 %1616 }
0x1c67   :  { %v1621_v25 = vmul.f32 %v1617_v55, %v4806_v21 }
0x1c69   :  { %1624 = vst.msk [vmem:[%s4988_s5 + $0x8] sm:$0xff] %vm1622_vm7, %v1621_v25 }
0x1c6a   :  { %v2000_v18 = vpop.permute.xlu1 %1999 }
0x1c6b   :  { %v2005_v32 = vmul.f32 %v2000_v18, %v4801_v1 }
0x1c6e   :  { %v2385_v40 = vpop.permute.xlu1 %2384 }
0x1c6f   :  { %v1615_v59 = vpop.permute.xlu0 %1614  ;;  %v2390_v0 = vmul.f32 %v2385_v40, %v4801_v1 }
0x1c70   :  { %v1620_v23 = vmul.f32 %v1615_v59, %v4801_v1 }
0x1c72   :  { %1623 = vst.msk [vmem:[%s4988_s5] sm:$0xff] %vm1622_vm7, %v1620_v23  ;;  %v2770_v43 = vpop.permute.xlu1 %2769 }
0x1c73   :  { %2008 = vst.msk [vmem:[%s4988_s5] sm:$0xff] %vm2007_vm8, %v2005_v32  ;;  %v2775_v26 = vmul.f32 %v2770_v43, %v4801_v1  ;;  %v2002_v28 = vpop.permute.xlu0 %2001 }
0x1c74   :  { %2393 = vst.msk [vmem:[%s4988_s5] sm:$0xff] %vm2392_vm9, %v2390_v0  ;;  %v2006_v51 = vmul.f32 %v2002_v28, %v4806_v21 }
0x1c75   :  { %2778 = vst.msk [vmem:[%s4988_s5] sm:$0xff] %vm2777_vm10, %v2775_v26 }
0x1c76   :  { %2009 = vst.msk [vmem:[%s4988_s5 + $0x8] sm:$0xff] %vm2007_vm8, %v2006_v51  ;;  %v3172_v36 = vpop.permute.xlu1 %3171 }
0x1c77   :  { %3319 = vst.msk [vmem:[%s4986_s6 + $0x10] sm:$0xff] %vm54_vm0, %v3172_v36  ;;  %v2387_v3 = vpop.permute.xlu0 %2386 }
0x1c78   :  { %v2391_v38 = vmul.f32 %v2387_v3, %v4806_v21 }
0x1c7a   :  { %2394 = vst.msk [vmem:[%s4988_s5 + $0x8] sm:$0xff] %vm2392_vm9, %v2391_v38  ;;  %v3183_v22 = vpop.permute.xlu1 %3182 }
0x1c7b   :  { %3321 = vst.msk [vmem:[%s4986_s6 + $0x20] sm:$0xff] %vm54_vm0, %v3183_v22  ;;  %v2772_v6 = vpop.permute.xlu0 %2771 }
0x1c7c   :  { %v2776_v5 = vmul.f32 %v2772_v6, %v4806_v21 }
0x1c7e   :  { %2779 = vst.msk [vmem:[%s4988_s5 + $0x8] sm:$0xff] %vm2777_vm10, %v2776_v5  ;;  %v3155_v9 = vpop.permute.xlu1 %3154 }
0x1c7f   :  { %v3160_v10 = vmul.f32 %v3155_v9, %v4801_v1  ;;  %v3174_v12 = vpop.permute.xlu0 %3173 }
0x1c80   :  { %3320 = vst.msk [vmem:[%s4986_s6 + $0x18] sm:$0xff] %vm54_vm0, %v3174_v12 }
0x1c81   :  { %3163 = vst.msk [vmem:[%s4988_s5] sm:$0xff] %vm3162_vm11, %v3160_v10 }
0x1c82   :  { %v3194_v4 = vpop.permute.xlu1 %3193 }
0x1c83   :  { %3323 = vst.msk [vmem:[%s4986_s6 + $0x30] sm:$0xff] %vm54_vm0, %v3194_v4  ;;  %v3185_v14 = vpop.permute.xlu0 %3184 }
0x1c84   :  { %3322 = vst.msk [vmem:[%s4986_s6 + $0x28] sm:$0xff] %vm54_vm0, %v3185_v14 }
0x1c87   :  { %v3157_v1 = vpop.permute.xlu0 %3156 }
0x1c88   :  { %v3161_v7 = vmul.f32 %v3157_v1, %v4806_v21 }
0x1c8a   :  { %3164 = vst.msk [vmem:[%s4988_s5 + $0x8] sm:$0xff] %vm3162_vm11, %v3161_v7 }
0x1c8b   :  { %v3196_v16 = vpop.permute.xlu0 %3195 }
0x1c8c   :  { %3324 = vst.msk [vmem:[%s4986_s6 + $0x38] sm:$0xff] %vm54_vm0, %v3196_v16 }

</bundles_post_ra>
